<compile_context>
chip_gen: v6e
topology: v6e:2x2x1
jax: 0.10.0
libtpu: 0.0.40
codegen_flags: <defaults>
</compile_context>

<pallas_src>
import functools

import jax
import jax.numpy as jnp
from jax.experimental import pallas as pl
from jax.experimental.pallas import tpu as pltpu


def _round_up(x, m):
    return ((x + m - 1) // m) * m


def _classifier_head_kernel(T_total, time_tile, needs_mask, inv_T,
                            h_ref,
                            w1_ref, b1_ref, w2_ref, b2_ref,
                            w3_ref, b3_ref, w4_ref, b4_ref,
                            out_ref, acc_ref):
    t = pl.program_id(1)
    last_t = pl.num_programs(1) - 1

    @pl.when(t == 0)
    def _():
        acc_ref[...] = jnp.zeros_like(acc_ref)

    def _accumulate(mask):
        h = h_ref[...]            # (batch_tile, time_tile, H) in input dtype
        if mask:
            # Zero out-of-range time rows of the ragged final tile.
            t_ids = t * time_tile + jax.lax.broadcasted_iota(
                jnp.int32, h.shape, 1)
            h = jnp.where(t_ids < T_total, h, jnp.zeros_like(h))
        # Running time-sum accumulated in f32 (hides under the streaming DMA).
        acc_ref[...] += jnp.sum(h, axis=1, dtype=jnp.float32)

    if needs_mask:
        # Hot loop stays a pure add; iota/compare/select only on the last tile.
        @pl.when(t != last_t)
        def _():
            _accumulate(mask=False)

        @pl.when(t == last_t)
        def _():
            _accumulate(mask=True)
    else:
        _accumulate(mask=False)

    @pl.when(t == last_t)
    def _():
        # Mean in f32 *before* any narrow cast (no mantissa loss for large T).
        feats = acc_ref[...] * inv_T
        x = jnp.dot(feats.astype(w1_ref.dtype), w1_ref[...],
                    preferred_element_type=jnp.float32)
        x = jnp.maximum(x + b1_ref[...], 0.0)                 # linear1 + ReLU
        x = jnp.dot(x.astype(w2_ref.dtype), w2_ref[...],
                    preferred_element_type=jnp.float32)
        x = jnp.maximum(x + b2_ref[...], 0.0)                 # linear2 + ReLU
        x = jnp.dot(x.astype(w3_ref.dtype), w3_ref[...],
                    preferred_element_type=jnp.float32)
        x = jnp.maximum(x + b3_ref[...], 0.0)   # linear3 + "sigmoid1" (= ReLU)
        x = jnp.dot(x.astype(w4_ref.dtype), w4_ref[...],
                    preferred_element_type=jnp.float32)
        out_ref[...] = jax.nn.sigmoid(x + b4_ref[...]).astype(out_ref.dtype)


def wav2vec2_classifier_head(hidden_states, params, *,
                             batch_tile=None, time_tile=None):
    """hidden_states: (B, T, H); params: (in,out) weights and (1,d)/(d,) biases.

    Note: an explicit `time_tile` is rounded down to the sublane packing of
    the hidden-state dtype (8 for f32, 16 for bf16, 32 for 8-bit types).
    """
    B, T, H = hidden_states.shape
    h_itemsize = jnp.dtype(hidden_states.dtype).itemsize
    pack = {1: 32, 2: 16, 4: 8}.get(h_itemsize, 8)

    # ---- weights: lane-dense (multiple-of-128) zero padding (exact) ---------
    def _lane(n):
        return max(128, _round_up(n, 128))

    def _pad2(a, rows, cols):
        a = jnp.asarray(a)
        return jnp.pad(a, ((0, rows - a.shape[0]), (0, cols - a.shape[1])))

    def _bias(b, cols):
        b = jnp.asarray(b, jnp.float32).reshape(1, -1)
        return jnp.pad(b, ((0, 0), (0, cols - b.shape[1])))

    w1 = jnp.asarray(params["w1"]); D1 = w1.shape[1]
    w2 = jnp.asarray(params["w2"]); D2 = w2.shape[1]
    w3 = jnp.asarray(params["w3"]); D3 = w3.shape[1]
    w4 = jnp.asarray(params["w4"]); C = w4.shape[1]
    D1p, D2p, D3p, Cp = _lane(D1), _lane(D2), _lane(D3), _lane(C)

    w1 = _pad2(w1, H, D1p);   b1 = _bias(params["b1"], D1p)
    w2 = _pad2(w2, D1p, D2p); b2 = _bias(params["b2"], D2p)
    w3 = _pad2(w3, D2p, D3p); b3 = _bias(params["b3"], D3p)
    w4 = _pad2(w4, D3p, Cp);  b4 = _bias(params["b4"], Cp)

    # ---- generation-aware VMEM budget ---------------------------------------
    try:
        phys_vmem = int(pltpu.get_tpu_info().vmem_capacity_bytes)
    except Exception:
        phys_vmem = 64 << 20                       # conservative (v7x) default
    vmem_ceiling = max(32 << 20, phys_vmem - (8 << 20))   # leave Mosaic headroom
    per_buf_budget = min(16 << 20, vmem_ceiling // 4)     # ~14 MiB v7x / 16 MiB v5e-v6e

    # ---- tile selection ------------------------------------------------------
    if batch_tile is None:
        batch_tile = min(128, _round_up(B, 8))
        # Give v7x's second TensorCore at least one batch program (>=2 programs
        # on the "parallel" axis).  Total grid steps are unchanged on 1-TC
        # chips because the per-buffer byte budget (hence time tile) is fixed.
        batch_tile = min(batch_tile, max(8, _round_up(-(-B // 2), 8)))
    else:
        batch_tile = max(8, _round_up(int(batch_tile), 8))
    batch_tile = min(batch_tile, B)        # full-batch block is always legal
    num_b = -(-B // batch_tile)            # ragged last batch block is handled
                                           # in-kernel (rows are independent)

    if time_tile is None:
        row_bytes = max(1, batch_tile * H * h_itemsize)
        tt = per_buf_budget // row_bytes
        time_tile = max(pack, (tt // pack) * pack)
    else:
        time_tile = max(pack, (int(time_tile) // pack) * pack)
    if time_tile >= T:
        time_tile = T                      # full time axis is always legal
    num_t = -(-T // time_tile)
    needs_mask = (T % time_tile) != 0
    # TODO(synk): if time_tile is clamped by very short T, pl.Buffered(3) on the
    #             hidden-state spec would hide DMA-issue latency; not needed at
    #             the tile sizes chosen here.

    # ---- explicit VMEM limit (conservative: counts double-buffered consts) --
    const_bytes = sum(int(a.size) * jnp.dtype(a.dtype).itemsize
                      for a in (w1, b1, w2, b2, w3, b3, w4, b4))
    need = (2 * batch_tile * time_tile * H * h_itemsize   # hidden double-buffer
            + 2 * const_bytes
            + 2 * batch_tile * Cp * 4                     # output buffers
            + batch_tile * H * 4)                         # f32 accumulator
    vmem_limit = int(min(vmem_ceiling, max(need + (4 << 20), 32 << 20)))

    kernel = functools.partial(_classifier_head_kernel,
                               T, time_tile, needs_mask, 1.0 / float(T))

    def _call(single_buffer_consts):
        def _const_spec(arr):
            nd = arr.ndim
            idx = lambda b, t, _nd=nd: (0,) * _nd
            if single_buffer_consts:
                # Block index never changes -> one buffer is enough.
                return pl.BlockSpec(arr.shape, idx,
                                    pipeline_mode=pl.Buffered(1))
            return pl.BlockSpec(arr.shape, idx)

        return pl.pallas_call(
            kernel,
            out_shape=jax.ShapeDtypeStruct((B, Cp), jnp.float32),
            grid=(num_b, num_t),
            in_specs=[
                pl.BlockSpec((batch_tile, time_tile, H),
                             lambda b, t: (b, t, 0)),
                _const_spec(w1), _const_spec(b1),
                _const_spec(w2), _const_spec(b2),
                _const_spec(w3), _const_spec(b3),
                _const_spec(w4), _const_spec(b4),
            ],
            out_specs=pl.BlockSpec((batch_tile, Cp), lambda b, t: (b, 0)),
            scratch_shapes=[pltpu.VMEM((batch_tile, H), jnp.float32)],
            compiler_params=pltpu.CompilerParams(
                dimension_semantics=("parallel", "arbitrary"),
                vmem_limit_bytes=vmem_limit),
        )(hidden_states, w1, b1, w2, b2, w3, b3, w4, b4)

    try:
        out_padded = _call(True)
    except Exception:
        # pipeline_mode / Buffered(1) support varies; fall back to defaults.
        out_padded = _call(False)

    return out_padded[:, :C]


def _reference_head(hidden_states, params):
    h = hidden_states.astype(jnp.float32)
    feats = jnp.mean(h, axis=1)

    def lin(x, w, b):
        return x @ w.astype(jnp.float32) + jnp.asarray(b, jnp.float32).reshape(1, -1)

    x = jnp.maximum(lin(feats, params["w1"], params["b1"]), 0.0)
    x = jnp.maximum(lin(x, params["w2"], params["b2"]), 0.0)
    x = jnp.maximum(lin(x, params["w3"], params["b3"]), 0.0)
    x = lin(x, params["w4"], params["b4"])
    return jax.nn.sigmoid(x)


if __name__ == "__main__":
    # Small synthetic shapes consistent with the module's forward pass.
    B, T = 8, 24          # batch, time frames from the (stubbed) wav2vec2 backbone
    H = 32                # wav2vec2.config.hidden_size
    D1, D2 = 32, 16       # mlp_hidden_dim1, mlp_hidden_dim2
    C = 4                 # num_classes

    key = jax.random.PRNGKey(0)
    k_h, k1, k2, k3, k4, kb1, kb2, kb3, kb4 = jax.random.split(key, 9)

    hidden_states = jax.random.normal(k_h, (B, T, H), dtype=jnp.float32)
    params = {
        "w1": 0.1 * jax.random.normal(k1, (H, D1), dtype=jnp.float32),
        "b1": 0.1 * jax.random.normal(kb1, (1, D1), dtype=jnp.float32),
        "w2": 0.1 * jax.random.normal(k2, (D1, D2), dtype=jnp.float32),
        "b2": 0.1 * jax.random.normal(kb2, (1, D2), dtype=jnp.float32),
        "w3": 0.1 * jax.random.normal(k3, (D2, D2 // 2), dtype=jnp.float32),
        "b3": 0.1 * jax.random.normal(kb3, (1, D2 // 2), dtype=jnp.float32),
        "w4": 0.1 * jax.random.normal(k4, (D2 // 2, C), dtype=jnp.float32),
        "b4": 0.1 * jax.random.normal(kb4, (1, C), dtype=jnp.float32),
    }

    ref = _reference_head(hidden_states, params)

    # 1) f32 path; time_tile=16 forces a 2-step time grid with a ragged last
    #    tile, exercising the streaming accumulator + gated masking.
    out = wav2vec2_classifier_head(hidden_states, params, time_tile=16)
    out = jax.block_until_ready(out)
    assert out.shape == (B, C)
    assert jnp.allclose(out, ref, atol=1e-5, rtol=1e-5), "f32 mismatch vs reference"

    # 2) bf16 hidden states / weights (halves HBM traffic on the dominant
    #    read); accumulator and biases stay f32, matmuls accumulate in f32.
    hs_bf16 = hidden_states.astype(jnp.bfloat16)
    params_bf16 = dict(params)
    for name in ("w1", "w2", "w3", "w4"):
        params_bf16[name] = params[name].astype(jnp.bfloat16)
    out_bf16 = wav2vec2_classifier_head(hs_bf16, params_bf16, time_tile=8)
    out_bf16 = jax.block_until_ready(out_bf16)
    assert out_bf16.shape == (B, C)
    assert jnp.allclose(out_bf16, ref, atol=5e-2), "bf16 mismatch vs reference"

    # 3) ragged batch (B not a multiple of the batch tile) with default tiles:
    #    exercises the no-host-pad path (grid (2,1), masked tail rows on write).
    B2 = 12
    hs2 = jax.random.normal(jax.random.PRNGKey(1), (B2, T, H), dtype=jnp.float32)
    ref2 = _reference_head(hs2, params)
    out2 = wav2vec2_classifier_head(hs2, params)
    out2 = jax.block_until_ready(out2)
    assert out2.shape == (B2, C)
    assert jnp.allclose(out2, ref2, atol=1e-5, rtol=1e-5), "ragged-batch mismatch"

    print("KERNEL_OK")
</pallas_src>

<mosaic_0001>
module attributes {stable_mosaic.version = 11 : i64} {
  func.func @_classifier_head_kernel(%arg0: i32, %arg1: i32, %arg2: memref<8x16x32xf32, #tpu.memory_space<vmem>>, %arg3: memref<32x128xf32, #tpu.memory_space<vmem>>, %arg4: memref<1x128xf32, #tpu.memory_space<vmem>>, %arg5: memref<128x128xf32, #tpu.memory_space<vmem>>, %arg6: memref<1x128xf32, #tpu.memory_space<vmem>>, %arg7: memref<128x128xf32, #tpu.memory_space<vmem>>, %arg8: memref<1x128xf32, #tpu.memory_space<vmem>>, %arg9: memref<128x128xf32, #tpu.memory_space<vmem>>, %arg10: memref<1x128xf32, #tpu.memory_space<vmem>>, %arg11: memref<8x128xf32, #tpu.memory_space<vmem>>, %arg12: memref<8x32xf32, #tpu.memory_space<vmem>>) attributes {dimension_semantics = [#tpu.dimension_semantics<parallel>, #tpu.dimension_semantics<arbitrary>], iteration_bounds = array<i64: 1, 2>, scalar_prefetch = 0 : i64, scratch_operands = 1 : i64, tpu.core_type = #tpu.core_type<tc>, window_params = [{transform_indices = @transform_0, window_bounds = array<i64: 8, 16, 32>}, {pipeline_mode = #tpu.pipeline_mode<synchronous>, transform_indices = @transform_1, window_bounds = array<i64: 32, 128>}, {pipeline_mode = #tpu.pipeline_mode<synchronous>, transform_indices = @transform_2, window_bounds = array<i64: 1, 128>}, {pipeline_mode = #tpu.pipeline_mode<synchronous>, transform_indices = @transform_3, window_bounds = array<i64: 128, 128>}, {pipeline_mode = #tpu.pipeline_mode<synchronous>, transform_indices = @transform_4, window_bounds = array<i64: 1, 128>}, {pipeline_mode = #tpu.pipeline_mode<synchronous>, transform_indices = @transform_5, window_bounds = array<i64: 128, 128>}, {pipeline_mode = #tpu.pipeline_mode<synchronous>, transform_indices = @transform_6, window_bounds = array<i64: 1, 128>}, {pipeline_mode = #tpu.pipeline_mode<synchronous>, transform_indices = @transform_7, window_bounds = array<i64: 128, 128>}, {pipeline_mode = #tpu.pipeline_mode<synchronous>, transform_indices = @transform_8, window_bounds = array<i64: 1, 128>}, {transform_indices = @transform_9, window_bounds = array<i64: 8, 128>}]} {
    %c0_i32 = arith.constant 0 : i32
    %0 = arith.cmpi eq, %arg1, %c0_i32 : i32
    %1 = arith.extui %0 : i1 to i32
    %c0_i32_0 = arith.constant 0 : i32
    %2 = arith.cmpi ne, %1, %c0_i32_0 : i32
    scf.if %2 {
      %cst = arith.constant 0.000000e+00 : f32
      %12 = vector.broadcast %cst : f32 to vector<8x32xf32>
      %c0 = arith.constant 0 : index
      %c0_6 = arith.constant 0 : index
      %13 = vector.load %arg12[%c0, %c0_6] : memref<8x32xf32, #tpu.memory_space<vmem>>, vector<8x32xf32>
      tpu.vector_store %arg12[%c0, %c0_6], %12 {strides = array<i32>} : memref<8x32xf32, #tpu.memory_space<vmem>>, vector<8x32xf32>,
    } else {
    }
    %c1_i32 = arith.constant 1 : i32
    %3 = arith.cmpi ne, %arg1, %c1_i32 : i32
    %4 = arith.extui %3 : i1 to i32
    %c0_i32_1 = arith.constant 0 : i32
    %5 = arith.cmpi ne, %4, %c0_i32_1 : i32
    scf.if %5 {
      %c0 = arith.constant 0 : index
      %c0_6 = arith.constant 0 : index
      %c0_7 = arith.constant 0 : index
      %12 = vector.load %arg2[%c0, %c0_6, %c0_7] : memref<8x16x32xf32, #tpu.memory_space<vmem>>, vector<8x16x32xf32>
      %c0_8 = arith.constant 0 : index
      %c0_9 = arith.constant 0 : index
      %13 = vector.load %arg12[%c0_8, %c0_9] : memref<8x32xf32, #tpu.memory_space<vmem>>, vector<8x32xf32>
      %cst = arith.constant dense<0.000000e+00> : vector<8x32xf32>
      %14 = vector.multi_reduction <add>, %12, %cst [1] : vector<8x16x32xf32> to vector<8x32xf32>
      %15 = arith.addf %13, %14 : vector<8x32xf32>
      %c0_10 = arith.constant 0 : index
      %c0_11 = arith.constant 0 : index
      %16 = vector.load %arg12[%c0_10, %c0_11] : memref<8x32xf32, #tpu.memory_space<vmem>>, vector<8x32xf32>
      tpu.vector_store %arg12[%c0_10, %c0_11], %15 {strides = array<i32>} : memref<8x32xf32, #tpu.memory_space<vmem>>, vector<8x32xf32>,
    } else {
    }
    %c1_i32_2 = arith.constant 1 : i32
    %6 = arith.cmpi eq, %arg1, %c1_i32_2 : i32
    %7 = arith.extui %6 : i1 to i32
    %c0_i32_3 = arith.constant 0 : i32
    %8 = arith.cmpi ne, %7, %c0_i32_3 : i32
    scf.if %8 {
      %c0 = arith.constant 0 : index
      %c0_6 = arith.constant 0 : index
      %c0_7 = arith.constant 0 : index
      %12 = vector.load %arg2[%c0, %c0_6, %c0_7] : memref<8x16x32xf32, #tpu.memory_space<vmem>>, vector<8x16x32xf32>
      %c16_i32 = arith.constant 16 : i32
      %13 = arith.muli %arg1, %c16_i32 : i32
      %14 = tpu.iota {dimensions = array<i32: 1>} : vector<8x16x32xi32>
      %15 = vector.broadcast %13 : i32 to vector<8x16x32xi32>
      %16 = arith.addi %15, %14 : vector<8x16x32xi32>
      %c24_i32 = arith.constant 24 : i32
      %17 = vector.broadcast %c24_i32 : i32 to vector<8x16x32xi32>
      %18 = arith.cmpi slt, %16, %17 : vector<8x16x32xi32>
      %cst = arith.constant 0.000000e+00 : f32
      %19 = vector.broadcast %cst : f32 to vector<8x16x32xf32>
      %20 = arith.select %18, %12, %19 : vector<8x16x32xi1>, vector<8x16x32xf32>
      %c0_8 = arith.constant 0 : index
      %c0_9 = arith.constant 0 : index
      %21 = vector.load %arg12[%c0_8, %c0_9] : memref<8x32xf32, #tpu.memory_space<vmem>>, vector<8x32xf32>
      %cst_10 = arith.constant dense<0.000000e+00> : vector<8x32xf32>
      %22 = vector.multi_reduction <add>, %20, %cst_10 [1] : vector<8x16x32xf32> to vector<8x32xf32>
      %23 = arith.addf %21, %22 : vector<8x32xf32>
      %c0_11 = arith.constant 0 : index
      %c0_12 = arith.constant 0 : index
      %24 = vector.load %arg12[%c0_11, %c0_12] : memref<8x32xf32, #tpu.memory_space<vmem>>, vector<8x32xf32>
      tpu.vector_store %arg12[%c0_11, %c0_12], %23 {strides = array<i32>} : memref<8x32xf32, #tpu.memory_space<vmem>>, vector<8x32xf32>,
    } else {
    }
    %c1_i32_4 = arith.constant 1 : i32
    %9 = arith.cmpi eq, %arg1, %c1_i32_4 : i32
    %10 = arith.extui %9 : i1 to i32
    %c0_i32_5 = arith.constant 0 : i32
    %11 = arith.cmpi ne, %10, %c0_i32_5 : i32
    scf.if %11 {
      %c0 = arith.constant 0 : index
      %c0_6 = arith.constant 0 : index
      %12 = vector.load %arg12[%c0, %c0_6] : memref<8x32xf32, #tpu.memory_space<vmem>>, vector<8x32xf32>
      %cst = arith.constant 0.0416666679 : f32
      %13 = vector.broadcast %cst : f32 to vector<8x32xf32>
      %14 = arith.mulf %12, %13 : vector<8x32xf32>
      %c0_7 = arith.constant 0 : index
      %c0_8 = arith.constant 0 : index
      %15 = vector.load %arg3[%c0_7, %c0_8] : memref<32x128xf32, #tpu.memory_space<vmem>>, vector<32x128xf32>
      %cst_9 = arith.constant dense<0.000000e+00> : vector<8x128xf32>
      %16 = tpu.matmul %14, %15, %cst_9 {dimension_numbers = #tpu.dot_dimension_numbers<[1], [0], [0], [1], [0, 0, 1, 1], [], []>} : vector<8x32xf32>, vector<32x128xf32>, vector<8x128xf32> -> vector<8x128xf32>
      %c0_10 = arith.constant 0 : index
      %c0_11 = arith.constant 0 : index
      %17 = vector.load %arg4[%c0_10, %c0_11] : memref<1x128xf32, #tpu.memory_space<vmem>>, vector<1x128xf32>
      %18 = vector.broadcast %17 : vector<1x128xf32> to vector<8x128xf32>
      %19 = arith.addf %16, %18 : vector<8x128xf32>
      %cst_12 = arith.constant 0.000000e+00 : f32
      %20 = vector.broadcast %cst_12 : f32 to vector<8x128xf32>
      %21 = arith.maximumf %19, %20 : vector<8x128xf32>
      %c0_13 = arith.constant 0 : index
      %c0_14 = arith.constant 0 : index
      %22 = vector.load %arg5[%c0_13, %c0_14] : memref<128x128xf32, #tpu.memory_space<vmem>>, vector<128x128xf32>
      %cst_15 = arith.constant dense<0.000000e+00> : vector<8x128xf32>
      %23 = tpu.matmul %21, %22, %cst_15 {dimension_numbers = #tpu.dot_dimension_numbers<[1], [0], [0], [1], [0, 0, 1, 1], [], []>} : vector<8x128xf32>, vector<128x128xf32>, vector<8x128xf32> -> vector<8x128xf32>
      %c0_16 = arith.constant 0 : index
      %c0_17 = arith.constant 0 : index
      %24 = vector.load %arg6[%c0_16, %c0_17] : memref<1x128xf32, #tpu.memory_space<vmem>>, vector<1x128xf32>
      %25 = vector.broadcast %24 : vector<1x128xf32> to vector<8x128xf32>
      %26 = arith.addf %23, %25 : vector<8x128xf32>
      %cst_18 = arith.constant 0.000000e+00 : f32
      %27 = vector.broadcast %cst_18 : f32 to vector<8x128xf32>
      %28 = arith.maximumf %26, %27 : vector<8x128xf32>
      %c0_19 = arith.constant 0 : index
      %c0_20 = arith.constant 0 : index
      %29 = vector.load %arg7[%c0_19, %c0_20] : memref<128x128xf32, #tpu.memory_space<vmem>>, vector<128x128xf32>
      %cst_21 = arith.constant dense<0.000000e+00> : vector<8x128xf32>
      %30 = tpu.matmul %28, %29, %cst_21 {dimension_numbers = #tpu.dot_dimension_numbers<[1], [0], [0], [1], [0, 0, 1, 1], [], []>} : vector<8x128xf32>, vector<128x128xf32>, vector<8x128xf32> -> vector<8x128xf32>
      %c0_22 = arith.constant 0 : index
      %c0_23 = arith.constant 0 : index
      %31 = vector.load %arg8[%c0_22, %c0_23] : memref<1x128xf32, #tpu.memory_space<vmem>>, vector<1x128xf32>
      %32 = vector.broadcast %31 : vector<1x128xf32> to vector<8x128xf32>
      %33 = arith.addf %30, %32 : vector<8x128xf32>
      %cst_24 = arith.constant 0.000000e+00 : f32
      %34 = vector.broadcast %cst_24 : f32 to vector<8x128xf32>
      %35 = arith.maximumf %33, %34 : vector<8x128xf32>
      %c0_25 = arith.constant 0 : index
      %c0_26 = arith.constant 0 : index
      %36 = vector.load %arg9[%c0_25, %c0_26] : memref<128x128xf32, #tpu.memory_space<vmem>>, vector<128x128xf32>
      %cst_27 = arith.constant dense<0.000000e+00> : vector<8x128xf32>
      %37 = tpu.matmul %35, %36, %cst_27 {dimension_numbers = #tpu.dot_dimension_numbers<[1], [0], [0], [1], [0, 0, 1, 1], [], []>} : vector<8x128xf32>, vector<128x128xf32>, vector<8x128xf32> -> vector<8x128xf32>
      %c0_28 = arith.constant 0 : index
      %c0_29 = arith.constant 0 : index
      %38 = vector.load %arg10[%c0_28, %c0_29] : memref<1x128xf32, #tpu.memory_space<vmem>>, vector<1x128xf32>
      %39 = vector.broadcast %38 : vector<1x128xf32> to vector<8x128xf32>
      %40 = arith.addf %37, %39 : vector<8x128xf32>
      %41 = arith.negf %40 : vector<8x128xf32>
      %42 = math.exp %41 : vector<8x128xf32>
      %cst_30 = arith.constant 1.000000e+00 : f32
      %43 = vector.broadcast %cst_30 : f32 to vector<8x128xf32>
      %44 = arith.addf %43, %42 : vector<8x128xf32>
      %45 = arith.divf %43, %44 : vector<8x128xf32>
      %c0_31 = arith.constant 0 : index
      %c0_32 = arith.constant 0 : index
      %46 = vector.load %arg11[%c0_31, %c0_32] : memref<8x128xf32, #tpu.memory_space<vmem>>, vector<8x128xf32>
      tpu.vector_store %arg11[%c0_31, %c0_32], %45 {strides = array<i32>} : memref<8x128xf32, #tpu.memory_space<vmem>>, vector<8x128xf32>,
    } else {
    }
    return
  }
  func.func @transform_0(%arg0: i32, %arg1: i32) -> (i32, i32, i32) {
    %c0_i32 = arith.constant 0 : i32
    %c0_i32_0 = arith.constant 0 : i32
    return %arg0, %arg1, %c0_i32 : i32, i32, i32
  }
  func.func @transform_1(%arg0: i32, %arg1: i32) -> (i32, i32) {
    %c0_i32 = arith.constant 0 : i32
    %c0_i32_0 = arith.constant 0 : i32
    %c0_i32_1 = arith.constant 0 : i32
    return %c0_i32, %c0_i32_0 : i32, i32
  }
  func.func @transform_2(%arg0: i32, %arg1: i32) -> (i32, i32) {
    %c0_i32 = arith.constant 0 : i32
    %c0_i32_0 = arith.constant 0 : i32
    %c0_i32_1 = arith.constant 0 : i32
    return %c0_i32, %c0_i32_0 : i32, i32
  }
  func.func @transform_3(%arg0: i32, %arg1: i32) -> (i32, i32) {
    %c0_i32 = arith.constant 0 : i32
    %c0_i32_0 = arith.constant 0 : i32
    %c0_i32_1 = arith.constant 0 : i32
    return %c0_i32, %c0_i32_0 : i32, i32
  }
  func.func @transform_4(%arg0: i32, %arg1: i32) -> (i32, i32) {
    %c0_i32 = arith.constant 0 : i32
    %c0_i32_0 = arith.constant 0 : i32
    %c0_i32_1 = arith.constant 0 : i32
    return %c0_i32, %c0_i32_0 : i32, i32
  }
  func.func @transform_5(%arg0: i32, %arg1: i32) -> (i32, i32) {
    %c0_i32 = arith.constant 0 : i32
    %c0_i32_0 = arith.constant 0 : i32
    %c0_i32_1 = arith.constant 0 : i32
    return %c0_i32, %c0_i32_0 : i32, i32
  }
  func.func @transform_6(%arg0: i32, %arg1: i32) -> (i32, i32) {
    %c0_i32 = arith.constant 0 : i32
    %c0_i32_0 = arith.constant 0 : i32
    %c0_i32_1 = arith.constant 0 : i32
    return %c0_i32, %c0_i32_0 : i32, i32
  }
  func.func @transform_7(%arg0: i32, %arg1: i32) -> (i32, i32) {
    %c0_i32 = arith.constant 0 : i32
    %c0_i32_0 = arith.constant 0 : i32
    %c0_i32_1 = arith.constant 0 : i32
    return %c0_i32, %c0_i32_0 : i32, i32
  }
  func.func @transform_8(%arg0: i32, %arg1: i32) -> (i32, i32) {
    %c0_i32 = arith.constant 0 : i32
    %c0_i32_0 = arith.constant 0 : i32
    %c0_i32_1 = arith.constant 0 : i32
    return %c0_i32, %c0_i32_0 : i32, i32
  }
  func.func @transform_9(%arg0: i32, %arg1: i32) -> (i32, i32) {
    %c0_i32 = arith.constant 0 : i32
    %c0_i32_0 = arith.constant 0 : i32
    return %arg0, %c0_i32 : i32, i32
  }
}

module attributes {stable_mosaic.version = 11 : i64} {
  func.func @_classifier_head_kernel(%arg0: i32, %arg1: i32, %arg2: memref<8x16x32xf32, #tpu.memory_space<vmem>>, %arg3: memref<32x128xf32, #tpu.memory_space<vmem>>, %arg4: memref<1x128xf32, #tpu.memory_space<vmem>>, %arg5: memref<128x128xf32, #tpu.memory_space<vmem>>, %arg6: memref<1x128xf32, #tpu.memory_space<vmem>>, %arg7: memref<128x128xf32, #tpu.memory_space<vmem>>, %arg8: memref<1x128xf32, #tpu.memory_space<vmem>>, %arg9: memref<128x128xf32, #tpu.memory_space<vmem>>, %arg10: memref<1x128xf32, #tpu.memory_space<vmem>>, %arg11: memref<8x128xf32, #tpu.memory_space<vmem>>, %arg12: memref<8x32xf32, #tpu.memory_space<vmem>>) attributes {dimension_semantics = [#tpu.dimension_semantics<parallel>, #tpu.dimension_semantics<arbitrary>], iteration_bounds = array<i64: 1, 2>, scalar_prefetch = 0 : i64, scratch_operands = 1 : i64, tpu.core_type = #tpu.core_type<tc>, window_params = [{transform_indices = @transform_0, window_bounds = array<i64: 8, 16, 32>}, {pipeline_mode = #tpu.pipeline_mode<synchronous>, transform_indices = @transform_1, window_bounds = array<i64: 32, 128>}, {pipeline_mode = #tpu.pipeline_mode<synchronous>, transform_indices = @transform_2, window_bounds = array<i64: 1, 128>}, {pipeline_mode = #tpu.pipeline_mode<synchronous>, transform_indices = @transform_3, window_bounds = array<i64: 128, 128>}, {pipeline_mode = #tpu.pipeline_mode<synchronous>, transform_indices = @transform_4, window_bounds = array<i64: 1, 128>}, {pipeline_mode = #tpu.pipeline_mode<synchronous>, transform_indices = @transform_5, window_bounds = array<i64: 128, 128>}, {pipeline_mode = #tpu.pipeline_mode<synchronous>, transform_indices = @transform_6, window_bounds = array<i64: 1, 128>}, {pipeline_mode = #tpu.pipeline_mode<synchronous>, transform_indices = @transform_7, window_bounds = array<i64: 128, 128>}, {pipeline_mode = #tpu.pipeline_mode<synchronous>, transform_indices = @transform_8, window_bounds = array<i64: 1, 128>}, {transform_indices = @transform_9, window_bounds = array<i64: 8, 128>}]} {
    %c0_i32 = arith.constant 0 : i32
    %0 = arith.cmpi eq, %arg1, %c0_i32 : i32
    %1 = arith.extui %0 : i1 to i32
    %c0_i32_0 = arith.constant 0 : i32
    %2 = arith.cmpi ne, %1, %c0_i32_0 : i32
    scf.if %2 {
      %cst = arith.constant 0.000000e+00 : f32
      %12 = vector.broadcast %cst : f32 to vector<8x32xf32>
      %c0 = arith.constant 0 : index
      %c0_6 = arith.constant 0 : index
      %13 = vector.load %arg12[%c0, %c0_6] : memref<8x32xf32, #tpu.memory_space<vmem>>, vector<8x32xf32>
      tpu.vector_store %arg12[%c0, %c0_6], %12 {strides = array<i32>} : memref<8x32xf32, #tpu.memory_space<vmem>>, vector<8x32xf32>,
    } else {
    }
    %c1_i32 = arith.constant 1 : i32
    %3 = arith.cmpi ne, %arg1, %c1_i32 : i32
    %4 = arith.extui %3 : i1 to i32
    %c0_i32_1 = arith.constant 0 : i32
    %5 = arith.cmpi ne, %4, %c0_i32_1 : i32
    scf.if %5 {
      %c0 = arith.constant 0 : index
      %c0_6 = arith.constant 0 : index
      %c0_7 = arith.constant 0 : index
      %12 = vector.load %arg2[%c0, %c0_6, %c0_7] : memref<8x16x32xf32, #tpu.memory_space<vmem>>, vector<8x16x32xf32>
      %c0_8 = arith.constant 0 : index
      %c0_9 = arith.constant 0 : index
      %13 = vector.load %arg12[%c0_8, %c0_9] : memref<8x32xf32, #tpu.memory_space<vmem>>, vector<8x32xf32>
      %cst = arith.constant dense<0.000000e+00> : vector<8x32xf32>
      %14 = vector.multi_reduction <add>, %12, %cst [1] : vector<8x16x32xf32> to vector<8x32xf32>
      %15 = arith.addf %13, %14 : vector<8x32xf32>
      %c0_10 = arith.constant 0 : index
      %c0_11 = arith.constant 0 : index
      %16 = vector.load %arg12[%c0_10, %c0_11] : memref<8x32xf32, #tpu.memory_space<vmem>>, vector<8x32xf32>
      tpu.vector_store %arg12[%c0_10, %c0_11], %15 {strides = array<i32>} : memref<8x32xf32, #tpu.memory_space<vmem>>, vector<8x32xf32>,
    } else {
    }
    %c1_i32_2 = arith.constant 1 : i32
    %6 = arith.cmpi eq, %arg1, %c1_i32_2 : i32
    %7 = arith.extui %6 : i1 to i32
    %c0_i32_3 = arith.constant 0 : i32
    %8 = arith.cmpi ne, %7, %c0_i32_3 : i32
    scf.if %8 {
      %c0 = arith.constant 0 : index
      %c0_6 = arith.constant 0 : index
      %c0_7 = arith.constant 0 : index
      %12 = vector.load %arg2[%c0, %c0_6, %c0_7] : memref<8x16x32xf32, #tpu.memory_space<vmem>>, vector<8x16x32xf32>
      %c16_i32 = arith.constant 16 : i32
      %13 = arith.muli %arg1, %c16_i32 : i32
      %14 = tpu.iota {dimensions = array<i32: 1>} : vector<8x16x32xi32>
      %15 = vector.broadcast %13 : i32 to vector<8x16x32xi32>
      %16 = arith.addi %15, %14 : vector<8x16x32xi32>
      %c24_i32 = arith.constant 24 : i32
      %17 = vector.broadcast %c24_i32 : i32 to vector<8x16x32xi32>
      %18 = arith.cmpi slt, %16, %17 : vector<8x16x32xi32>
      %cst = arith.constant 0.000000e+00 : f32
      %19 = vector.broadcast %cst : f32 to vector<8x16x32xf32>
      %20 = arith.select %18, %12, %19 : vector<8x16x32xi1>, vector<8x16x32xf32>
      %c0_8 = arith.constant 0 : index
      %c0_9 = arith.constant 0 : index
      %21 = vector.load %arg12[%c0_8, %c0_9] : memref<8x32xf32, #tpu.memory_space<vmem>>, vector<8x32xf32>
      %cst_10 = arith.constant dense<0.000000e+00> : vector<8x32xf32>
      %22 = vector.multi_reduction <add>, %20, %cst_10 [1] : vector<8x16x32xf32> to vector<8x32xf32>
      %23 = arith.addf %21, %22 : vector<8x32xf32>
      %c0_11 = arith.constant 0 : index
      %c0_12 = arith.constant 0 : index
      %24 = vector.load %arg12[%c0_11, %c0_12] : memref<8x32xf32, #tpu.memory_space<vmem>>, vector<8x32xf32>
      tpu.vector_store %arg12[%c0_11, %c0_12], %23 {strides = array<i32>} : memref<8x32xf32, #tpu.memory_space<vmem>>, vector<8x32xf32>,
    } else {
    }
    %c1_i32_4 = arith.constant 1 : i32
    %9 = arith.cmpi eq, %arg1, %c1_i32_4 : i32
    %10 = arith.extui %9 : i1 to i32
    %c0_i32_5 = arith.constant 0 : i32
    %11 = arith.cmpi ne, %10, %c0_i32_5 : i32
    scf.if %11 {
      %c0 = arith.constant 0 : index
      %c0_6 = arith.constant 0 : index
      %12 = vector.load %arg12[%c0, %c0_6] : memref<8x32xf32, #tpu.memory_space<vmem>>, vector<8x32xf32>
      %cst = arith.constant 0.0416666679 : f32
      %13 = vector.broadcast %cst : f32 to vector<8x32xf32>
      %14 = arith.mulf %12, %13 : vector<8x32xf32>
      %c0_7 = arith.constant 0 : index
      %c0_8 = arith.constant 0 : index
      %15 = vector.load %arg3[%c0_7, %c0_8] : memref<32x128xf32, #tpu.memory_space<vmem>>, vector<32x128xf32>
      %cst_9 = arith.constant dense<0.000000e+00> : vector<8x128xf32>
      %16 = tpu.matmul %14, %15, %cst_9 {dimension_numbers = #tpu.dot_dimension_numbers<[1], [0], [0], [1], [0, 0, 1, 1], [], []>} : vector<8x32xf32>, vector<32x128xf32>, vector<8x128xf32> -> vector<8x128xf32>
      %c0_10 = arith.constant 0 : index
      %c0_11 = arith.constant 0 : index
      %17 = vector.load %arg4[%c0_10, %c0_11] : memref<1x128xf32, #tpu.memory_space<vmem>>, vector<1x128xf32>
      %18 = vector.broadcast %17 : vector<1x128xf32> to vector<8x128xf32>
      %19 = arith.addf %16, %18 : vector<8x128xf32>
      %cst_12 = arith.constant 0.000000e+00 : f32
      %20 = vector.broadcast %cst_12 : f32 to vector<8x128xf32>
      %21 = arith.maximumf %19, %20 : vector<8x128xf32>
      %c0_13 = arith.constant 0 : index
      %c0_14 = arith.constant 0 : index
      %22 = vector.load %arg5[%c0_13, %c0_14] : memref<128x128xf32, #tpu.memory_space<vmem>>, vector<128x128xf32>
      %cst_15 = arith.constant dense<0.000000e+00> : vector<8x128xf32>
      %23 = tpu.matmul %21, %22, %cst_15 {dimension_numbers = #tpu.dot_dimension_numbers<[1], [0], [0], [1], [0, 0, 1, 1], [], []>} : vector<8x128xf32>, vector<128x128xf32>, vector<8x128xf32> -> vector<8x128xf32>
      %c0_16 = arith.constant 0 : index
      %c0_17 = arith.constant 0 : index
      %24 = vector.load %arg6[%c0_16, %c0_17] : memref<1x128xf32, #tpu.memory_space<vmem>>, vector<1x128xf32>
      %25 = vector.broadcast %24 : vector<1x128xf32> to vector<8x128xf32>
      %26 = arith.addf %23, %25 : vector<8x128xf32>
      %cst_18 = arith.constant 0.000000e+00 : f32
      %27 = vector.broadcast %cst_18 : f32 to vector<8x128xf32>
      %28 = arith.maximumf %26, %27 : vector<8x128xf32>
      %c0_19 = arith.constant 0 : index
      %c0_20 = arith.constant 0 : index
      %29 = vector.load %arg7[%c0_19, %c0_20] : memref<128x128xf32, #tpu.memory_space<vmem>>, vector<128x128xf32>
      %cst_21 = arith.constant dense<0.000000e+00> : vector<8x128xf32>
      %30 = tpu.matmul %28, %29, %cst_21 {dimension_numbers = #tpu.dot_dimension_numbers<[1], [0], [0], [1], [0, 0, 1, 1], [], []>} : vector<8x128xf32>, vector<128x128xf32>, vector<8x128xf32> -> vector<8x128xf32>
      %c0_22 = arith.constant 0 : index
      %c0_23 = arith.constant 0 : index
      %31 = vector.load %arg8[%c0_22, %c0_23] : memref<1x128xf32, #tpu.memory_space<vmem>>, vector<1x128xf32>
      %32 = vector.broadcast %31 : vector<1x128xf32> to vector<8x128xf32>
      %33 = arith.addf %30, %32 : vector<8x128xf32>
      %cst_24 = arith.constant 0.000000e+00 : f32
      %34 = vector.broadcast %cst_24 : f32 to vector<8x128xf32>
      %35 = arith.maximumf %33, %34 : vector<8x128xf32>
      %c0_25 = arith.constant 0 : index
      %c0_26 = arith.constant 0 : index
      %36 = vector.load %arg9[%c0_25, %c0_26] : memref<128x128xf32, #tpu.memory_space<vmem>>, vector<128x128xf32>
      %cst_27 = arith.constant dense<0.000000e+00> : vector<8x128xf32>
      %37 = tpu.matmul %35, %36, %cst_27 {dimension_numbers = #tpu.dot_dimension_numbers<[1], [0], [0], [1], [0, 0, 1, 1], [], []>} : vector<8x128xf32>, vector<128x128xf32>, vector<8x128xf32> -> vector<8x128xf32>
      %c0_28 = arith.constant 0 : index
      %c0_29 = arith.constant 0 : index
      %38 = vector.load %arg10[%c0_28, %c0_29] : memref<1x128xf32, #tpu.memory_space<vmem>>, vector<1x128xf32>
      %39 = vector.broadcast %38 : vector<1x128xf32> to vector<8x128xf32>
      %40 = arith.addf %37, %39 : vector<8x128xf32>
      %41 = arith.negf %40 : vector<8x128xf32>
      %42 = math.exp %41 : vector<8x128xf32>
      %cst_30 = arith.constant 1.000000e+00 : f32
      %43 = vector.broadcast %cst_30 : f32 to vector<8x128xf32>
      %44 = arith.addf %43, %42 : vector<8x128xf32>
      %45 = arith.divf %43, %44 : vector<8x128xf32>
      %c0_31 = arith.constant 0 : index
      %c0_32 = arith.constant 0 : index
      %46 = vector.load %arg11[%c0_31, %c0_32] : memref<8x128xf32, #tpu.memory_space<vmem>>, vector<8x128xf32>
      tpu.vector_store %arg11[%c0_31, %c0_32], %45 {strides = array<i32>} : memref<8x128xf32, #tpu.memory_space<vmem>>, vector<8x128xf32>,
    } else {
    }
    return
  }
  func.func @transform_0(%arg0: i32, %arg1: i32) -> (i32, i32, i32) {
    %c0_i32 = arith.constant 0 : i32
    %c0_i32_0 = arith.constant 0 : i32
    return %arg0, %arg1, %c0_i32 : i32, i32, i32
  }
  func.func @transform_1(%arg0: i32, %arg1: i32) -> (i32, i32) {
    %c0_i32 = arith.constant 0 : i32
    %c0_i32_0 = arith.constant 0 : i32
    %c0_i32_1 = arith.constant 0 : i32
    return %c0_i32, %c0_i32_0 : i32, i32
  }
  func.func @transform_2(%arg0: i32, %arg1: i32) -> (i32, i32) {
    %c0_i32 = arith.constant 0 : i32
    %c0_i32_0 = arith.constant 0 : i32
    %c0_i32_1 = arith.constant 0 : i32
    return %c0_i32, %c0_i32_0 : i32, i32
  }
  func.func @transform_3(%arg0: i32, %arg1: i32) -> (i32, i32) {
    %c0_i32 = arith.constant 0 : i32
    %c0_i32_0 = arith.constant 0 : i32
    %c0_i32_1 = arith.constant 0 : i32
    return %c0_i32, %c0_i32_0 : i32, i32
  }
  func.func @transform_4(%arg0: i32, %arg1: i32) -> (i32, i32) {
    %c0_i32 = arith.constant 0 : i32
    %c0_i32_0 = arith.constant 0 : i32
    %c0_i32_1 = arith.constant 0 : i32
    return %c0_i32, %c0_i32_0 : i32, i32
  }
  func.func @transform_5(%arg0: i32, %arg1: i32) -> (i32, i32) {
    %c0_i32 = arith.constant 0 : i32
    %c0_i32_0 = arith.constant 0 : i32
    %c0_i32_1 = arith.constant 0 : i32
    return %c0_i32, %c0_i32_0 : i32, i32
  }
  func.func @transform_6(%arg0: i32, %arg1: i32) -> (i32, i32) {
    %c0_i32 = arith.constant 0 : i32
    %c0_i32_0 = arith.constant 0 : i32
    %c0_i32_1 = arith.constant 0 : i32
    return %c0_i32, %c0_i32_0 : i32, i32
  }
  func.func @transform_7(%arg0: i32, %arg1: i32) -> (i32, i32) {
    %c0_i32 = arith.constant 0 : i32
    %c0_i32_0 = arith.constant 0 : i32
    %c0_i32_1 = arith.constant 0 : i32
    return %c0_i32, %c0_i32_0 : i32, i32
  }
  func.func @transform_8(%arg0: i32, %arg1: i32) -> (i32, i32) {
    %c0_i32 = arith.constant 0 : i32
    %c0_i32_0 = arith.constant 0 : i32
    %c0_i32_1 = arith.constant 0 : i32
    return %c0_i32, %c0_i32_0 : i32, i32
  }
  func.func @transform_9(%arg0: i32, %arg1: i32) -> (i32, i32) {
    %c0_i32 = arith.constant 0 : i32
    %c0_i32_0 = arith.constant 0 : i32
    return %arg0, %c0_i32 : i32, i32
  }
}

</mosaic_0001>

<bundles_post_ra>
// kernel: tpu_custom_call.1
= control target key start
LH: loop header
LB: loop body
LE: loop exit
PB: predicated region body
PF: predicated region fallthrough
CT: control target
= control target key end

     0   :  { %s2135_s0 = inlined_call_operand.hbm [shape: f32[8,24,32], index: 0, kind: input, shape index: {}]   ;;  %s2136_s1 = inlined_call_operand.hbm [shape: f32[32,128], index: 1, kind: input, shape index: {}]   ;;  %s2137_s2 = inlined_call_operand.vmem [shape: f32[1,128], index: 2, kind: input, shape index: {}]   ;;  %s2138_s3 = inlined_call_operand.hbm [shape: f32[128,128], index: 3, kind: input, shape index: {}]   ;;  %s2139_s4 = inlined_call_operand.vmem [shape: f32[1,128], index: 4, kind: input, shape index: {}]   ;;  %s2140_s5 = inlined_call_operand.hbm [shape: f32[128,128], index: 5, kind: input, shape index: {}]   ;;  %s2141_s6 = inlined_call_operand.vmem [shape: f32[1,128], index: 6, kind: input, shape index: {}]   ;;  %s2142_s7 = inlined_call_operand.hbm [shape: f32[128,128], index: 7, kind: input, shape index: {}]   ;;  %s2143_s8 = inlined_call_operand.vmem [shape: f32[1,128], index: 8, kind: input, shape index: {}]   ;;  %s2144_s9 = inlined_call_operand.hbm [shape: f32[8,128], index: 9, kind: output, shape index: {}]  }
   0x1   :  { %2148 = sst [smem:[#allocation21_spill]] %s2136_s1 }
   0x2   :  { %2149 = sst [smem:[#allocation22_spill]] %s2138_s3 }
   0x3   :  { %2150 = sst [smem:[#allocation23_spill]] %s2140_s5 }
   0x4   :  { %2151 = sst [smem:[#allocation24_spill]] %s2142_s7 }
   0x5   :  { %14 = vsyncpa [#allocation4], 0 }
   0x6   :  { %16 = vsyncpa [#allocation4 + $0x1], 0 }
   0x7   :  { %17 = vsyncpa [#allocation7], 0 }
   0x8   :  { %18 = vsyncpa [#allocation10], 0 }
   0x9   :  { %19 = vsyncpa [#allocation5], 0  ;;  %s1792_s30 = smov 0   ;;  %s1794_s10 = smov 0  }
   0xa   :  { %s1796_s11 = smov 0   ;;  %s1798_s12 = smov 0  }
   0xb   :  { %s1800_s13 = smov 0   ;;  %s1802_s14 = smov 0  }
   0xc LB: > { %2152 = sst [smem:[#allocation19_spill]] %s1721_s13  ;;  %s2145_s15 = sadd.s32 4294967295, %s1725_s14   ;;  %s1725_s14 = sphi %s1802_s14, %s25_s14   ;;  %s1721_s13 = sphi %s1800_s13, %s2166_s13   ;;  %s1717_s12 = sphi %s1798_s12, %s2165_s12   ;;  %s1713_s11 = sphi %s1796_s11, %s2169_s11   ;;  %s1709_s10 = sphi %s1794_s10, %s2168_s10   ;;  %s1705_s30 = sphi %s1792_s30, %s2167_s30  }
   0xd   : > { %s34_s16 = sadd.s32 1, %s1721_s13  ;;  %s46_s17 = sadd.s32 1, %s1713_s11 }
   0xe   : > { %p35_p0 = scmp.ge.s32.totalorder %s34_s16, 2  ;;  %p53_p1 = scmp.ne.s32.totalorder %s1713_s11, %s1709_s10 }
   0xf   : > { %p54_p2 = scmp.eq.s32.totalorder %s1725_s14, 0  ;;  %p59_p4 = scmp.ne.s32.totalorder %s1709_s10, %s1705_s30 }
  0x10   : > { %s2171_s16 = smov (%p35_p0, %s34_s16), 0  ;;  %p1837_p5 = scmp.eq.s32.totalorder %s2145_s15, 0 }
  0x11   : > { %2153 = sst [smem:[#allocation20_spill]] %s2171_s16  ;;  %p1828_p3 = por %p54_p2, %p53_p1 }
  0x12   : > { %s42_s19 = ssub.s32 %s1721_s13, %s2171_s16  ;;  %p1213_p7 = scmp.ge.s32.totalorder %s1725_s14, 1 }
  0x13   : > { %p44_p6 = scmp.eq.s32.totalorder %s42_s19, 0  ;;  %p1844_p8 = por %p1837_p5, %p59_p4 }
  0x14   : > { %p264_p9 = scmp.lt.s32.totalorder %s1725_s14, 3  ;;  %s1727_s24 = smov [#allocation6]  }
  0x15   : > { %s1850_s22 = scalar_select %p44_p6, %s1713_s11, %s46_s17  }
  0x16   : > { %p1852_p10 = pnand %p1213_p7, %p264_p9  ;;  %s276_s25 = sshll.u32 %s1727_s24, 4  ;;  %s277_s25 = int_to_ptr.vmem [resolvable:$true] %s276_s25 }
  0x17   : > { %s1728_s27 = smov [#allocation9]   ;;  %s1546_s29 = scalar_lea.vmem %s277_s25, 512 }
  0x18   : > { %p1445_p11 = pneg %p1852_p10  ;;  %s308_s28 = sshll.u32 %s1728_s27, 4  ;;  %s309_s28 = int_to_ptr.vmem [resolvable:$true] %s308_s28 }
  0x19   : > { %p1547_p0 = scmp.ne.s32.totalorder %s277_s25, %s1546_s29  ;;  %p1554_p4 = scmp.lt.s32.totalorder %s277_s25, %s277_s25 }
  0x1a   : > { %p1860_p12 = pnand %p1445_p11, %p1837_p5  ;;  %p1555_p6 = scmp.lt.s32.totalorder %s1546_s29, %s1546_s29 }
  0x1c   : > { %p1537_p13 = pneg %p1860_p12  ;;  %p1556_p7 = por %p1555_p6, %p1554_p4 }
  0x1e   : > { %p1549_p1 = pnand %p1547_p0, %p1537_p13 }
  0x20   : > { %p1550_p2 = pneg %p1549_p1 }
  0x22   : > { %p1557_p9 = pnand %p1556_p7, %p1550_p2 }
  0x24   : > { %1560 = shalt.err (!%p1557_p9)
}
  0x25   : > { %s1729_s30 = smov 128   ;;  %s1730_s17 = smov 8  }
  0x26   : > { %s2159_s1 = sld [smem:[#allocation21_spill]]  ;;  %s1572_s27 = scalar_lea.vmem %s309_s28, 2048 }
  0x27   : > { %p1573_p11 = scmp.ne.s32.totalorder %s309_s28, %s1572_s27  ;;  %p1580_p2 = scmp.lt.s32.totalorder %s309_s28, %s309_s28 }
  0x28   : > { %p1581_p4 = scmp.lt.s32.totalorder %s1572_s27, %s1572_s27 }
  0x29   : > { %p1575_p0 = pnand %p1573_p11, %p1537_p13 }
  0x2a   : > { %p1582_p6 = por %p1581_p4, %p1580_p2 }
  0x2b   : > { %p1576_p1 = pneg %p1575_p0 }
  0x2c   : > { %1448 = dma.hbm_to_vmem [thread:$0]  (!%p1860_p12), %s2159_s1, 512, %s277_s25, [#allocation7], %s1729_s30, %s1729_s30, %s1730_s17  }
  0x2d   : > { %p1583_p7 = pnand %p1582_p6, %p1576_p1 }
  0x2f   : > { %1586 = shalt.err (!%p1583_p7)
}
  0x30   : > { %s2160_s5 = sld [smem:[#allocation23_spill]]  ;;  %s1731_s25 = smov [#allocation8]  }
  0x31   : > { %s292_s19 = sshll.u32 %s1731_s25, 4  ;;  %s1732_s24 = smov [#allocation11]   ;;  %s293_s19 = int_to_ptr.vmem [resolvable:$true] %s292_s19 }
  0x32   : > { %s324_s1 = sshll.u32 %s1732_s24, 4  ;;  %s1598_s16 = scalar_lea.vmem %s293_s19, 2048  ;;  %s325_s1 = int_to_ptr.vmem [resolvable:$true] %s324_s1 }
  0x33   : > { %p1599_p9 = scmp.ne.s32.totalorder %s293_s19, %s1598_s16  ;;  %p1606_p1 = scmp.lt.s32.totalorder %s293_s19, %s293_s19 }
  0x34   : > { %p1607_p2 = scmp.lt.s32.totalorder %s1598_s16, %s1598_s16 }
  0x35   : > { %p1601_p11 = pnand %p1599_p9, %p1537_p13 }
  0x36   : > { %1454 = dma.hbm_to_vmem [thread:$0]  (!%p1860_p12), %s2160_s5, 2048, %s309_s28, [#allocation10], %s1729_s30, %s1729_s30, %s1730_s17  }
  0x37   : > { %p1602_p0 = pneg %p1601_p11  ;;  %p1608_p4 = por %p1607_p2, %p1606_p1 }
  0x39   : > { %p1609_p6 = pnand %p1608_p4, %p1602_p0 }
  0x3b   : > { %1612 = shalt.err (!%p1609_p6)
}
  0x3c   : > { %s2161_s3 = sld [smem:[#allocation22_spill]]  ;;  %s1624_s27 = scalar_lea.vmem %s325_s1, 2048 }
  0x3d   : > { %p1625_p7 = scmp.ne.s32.totalorder %s325_s1, %s1624_s27  ;;  %p1632_p1 = scmp.lt.s32.totalorder %s325_s1, %s325_s1 }
  0x3e   : > { %p1633_p0 = scmp.lt.s32.totalorder %s1624_s27, %s1624_s27 }
  0x3f   : > { %p1627_p9 = pnand %p1625_p7, %p1537_p13 }
  0x40   : > { %p1634_p2 = por %p1633_p0, %p1632_p1 }
  0x41   : > { %p1628_p11 = pneg %p1627_p9 }
  0x42   : > { %1451 = dma.hbm_to_vmem [thread:$0]  (!%p1860_p12), %s2161_s3, 2048, %s293_s19, [#allocation7], %s1729_s30, %s1729_s30, %s1730_s17  }
  0x43   : > { %p1635_p4 = pnand %p1634_p2, %p1628_p11 }
  0x45   : > { %1638 = shalt.err (!%p1635_p4)
}
  0x46   : > { %s2162_s7 = sld [smem:[#allocation24_spill]]  ;;  %p1218_p6 = scmp.ge.s32.totalorder %s1725_s14, 2 }
  0x48   : > { %337 = sbr.rel (%p1218_p6) target bundleno = 99 (0x63), region = 48 }
  0x4c   : > { %1457 = dma.hbm_to_vmem [thread:$0]  (!%p1860_p12), %s2162_s7, 2048, %s325_s1, [#allocation10], %s1729_s30, %s1729_s30, %s1730_s17  }
  0x4d   : > { %340 = sbr.rel (!%p1828_p3) target bundleno = 99 (0x63), region = 52 }
  0x52   : > { %s341_s25 = sand.u32 1, %s1713_s11   ;;  %s1220_s19 = sshll.u32 %s1721_s13, 1 }
  0x53   : > { %s1219_s24 = sshll.u32 %s341_s25, 7  ;;  %s348_s15 = ssub.s32 3, %s1220_s19 }
  0x54   : > { %p349_p13 = scmp.lt.s32.totalorder %s348_s15, 2  ;;  %s342_s27 = scalar_lea.sflag [#allocation4], %s341_s25 }
  0x55   : > { %s345_s3 = scalar_lea.vmem [#allocation3], %s1219_s24 }
  0x56   : > { %s2173_s15 = smov (!%p349_p13, %s348_s15), 2 }
  0x57   : > { %s1221_s26 = sshll.u32 %s2173_s15, 10 }
  0x58   : > { %s353_s28 = ssub.s32 2048, %s1221_s26 }
  0x59   : > { %354 = vsyncadd %s342_s27, %s353_s28  ;;  %p1222_p12 = scmp.ne.s32.totalorder %s1221_s26, 0  ;;  %s1249_s1 = sshll.u32 %s1721_s13, 8 }
  0x5a   : > { %s359_s18 = scalar_lea.hbm %s2135_s0, %s1249_s1  ;;  %s366_s16 = sld [smem:[#allocation0]]  }
  0x5b   : > { %s374_s29 = sshll.u32 %s345_s3, 4  ;;  %s1733_s5 = smov 384   ;;  %s375_s29 = int_to_ptr.vmem [resolvable:$true] %s374_s29 }
  0x5c   : > { %381 = sst [smem:[#allocation14]] %s1733_s5  ;;  %s1734_s19 = smov 256  }
  0x5d   : > { %385 = sst [smem:[#allocation14 + $0x2]] %s2173_s15  ;;  %s1735_s7 = smov 128  }
  0x5e   : > { %383 = sst [smem:[#allocation14 + $0x1]] %s1734_s19  ;;  %s1736_s28 = smov 8  }
  0x5f   : > { %387 = sst [smem:[#allocation14 + $0x3]] %s1735_s7  ;;  %s1737_s13 = smov 131072  }
  0x60   : > { %s1226_s25 = sshll.u32 %s366_s16, 26  ;;  %389 = sst [smem:[#allocation14 + $0x4]] %s1735_s7 }
  0x61   : > { %s1227_s24 = sadd.s32 134217728, %s1226_s25  ;;  %391 = sst [smem:[#allocation14 + $0x5]] %s1736_s28 }
  0x62   : > { %393 = dma.general (%p1222_p12), %s359_s18, %s1221_s26, %s375_s29, %s342_s27, %s1737_s13, [#allocation14], %s1227_s24, 0  }
  0x63 PF: > { %399 = sbr.rel (%p1852_p10) target bundleno = 1045 (0x415), region = 56  ;;  %s401_s3 = sand.u32 (!%p1852_p10), 1, %s1709_s10  }
  0x64   : > { %s1230_s5 = sshll.u32 (!%p1852_p10), %s401_s3, 7  ;;  %s402_s15 = scalar_lea.sflag (!%p1852_p10), [#allocation4], %s401_s3 }
  0x65   : > { %s1923_s1 = scalar_lea.vmem (!%p1852_p10), [#allocation3], %s1230_s5 }
  0x68   : > { %1688 = dma.done.wait (%p1844_p8), %s402_s15, 2048  }
  0x69   : > { %1690 = vsyncadd (%p1844_p8), %s402_s15, 4294965248 }
  0x6a   : > { %1692 = dma.done.wait (%p1837_p5), [#allocation7], 2560  }
  0x6b   : > { %1694 = vsyncadd (%p1837_p5), [#allocation7], 4294964736 }
  0x6c   : > { %1696 = dma.done.wait (%p1837_p5), [#allocation10], 4096  }
  0x6d   : > { %1698 = vsyncadd (%p1837_p5), [#allocation10], 4294963200  ;;  %p1235_p3 = scmp.ne.s32.totalorder %s1717_s12, 0 }
  0x6f   : > { %460 = sbr.rel (%p1235_p3) target bundleno = 118 (0x76), region = 80 }
  0x74   : > { %vm461_vm0 = vcmask 261120   ;;  %v1738_v0 = vmov 0.0  }
  0x75   : > { %462 = vst.msk [vmem:[#allocation2] sm:$0xff] %vm461_vm0, %v1738_v0 }
  0x76 PF: > { %p1236_p8 = scmp.eq.s32.totalorder %s1717_s12, 1 }
  0x78   : > { %466 = sbr.rel (%p1236_p8) target bundleno = 155 (0x9b), region = 84 }
  0x7d   : > { %v467_v1 = vld [vmem:[%s1923_s1] sm:$0xff]  ;;  %v468_v2 = vld [vmem:[%s1923_s1 + $0x8] sm:$0xff]  ;;  %v469_v3 = vld [vmem:[%s1923_s1 + $0x10] sm:$0xff]  ;;  %vm484_vm1 = vcmask 261120   ;;  %vm565_vm2 = vcmask 1041409   ;;  %vm567_vm3 = vcmask 1042434  }
  0x7e   : > { %v470_v4 = vld [vmem:[%s1923_s1 + $0x18] sm:$0xff]  ;;  %v471_v5 = vld [vmem:[%s1923_s1 + $0x20] sm:$0xff]  ;;  %v472_v6 = vld [vmem:[%s1923_s1 + $0x28] sm:$0xff]  ;;  %v485_v7 = vsel %vm484_vm1, %v467_v1, 0.0  ;;  %v486_v8 = vsel %vm484_vm1, %v468_v2, 0.0  ;;  %v494_v9 = vsel %vm484_vm1, %v469_v3, 0.0 }
  0x7f   : > { %v473_v10 = vld [vmem:[%s1923_s1 + $0x30] sm:$0xff]  ;;  %v474_v11 = vld [vmem:[%s1923_s1 + $0x38] sm:$0xff]  ;;  %v475_v12 = vld [vmem:[%s1923_s1 + $0x40] sm:$0xff]  ;;  %v487_v13 = vadd.f32 %v486_v8, %v485_v7  ;;  %v495_v14 = vsel %vm484_vm1, %v470_v4, 0.0  ;;  %v503_v15 = vsel %vm484_vm1, %v471_v5, 0.0  ;;  %v504_v16 = vsel %vm484_vm1, %v472_v6, 0.0 }
  0x80   : > { %v476_v17 = vld [vmem:[%s1923_s1 + $0x48] sm:$0xff]  ;;  %v477_v18 = vld [vmem:[%s1923_s1 + $0x50] sm:$0xff]  ;;  %v478_v19 = vld [vmem:[%s1923_s1 + $0x58] sm:$0xff]  ;;  %v496_v20 = vadd.f32 %v495_v14, %v494_v9  ;;  %v505_v21 = vadd.f32 %v504_v16, %v503_v15  ;;  %v512_v22 = vsel %vm484_vm1, %v473_v10, 0.0  ;;  %v513_v23 = vsel %vm484_vm1, %v474_v11, 0.0 }
  0x81   : > { %v479_v24 = vld [vmem:[%s1923_s1 + $0x60] sm:$0xff]  ;;  %v488_v25 = vrot.slane %v487_v13, 4  ;;  %v514_v26 = vadd.f32 %v513_v23, %v512_v22  ;;  %v521_v27 = vsel %vm484_vm1, %v475_v12, 0.0  ;;  %v522_v28 = vsel %vm484_vm1, %v476_v17, 0.0  ;;  %v480_v29 = vld [vmem:[%s1923_s1 + $0x68] sm:$0xff]  ;;  %v481_v30 = vld [vmem:[%s1923_s1 + $0x70] sm:$0xff] }
  0x82   : > { %v497_v31 = vrot.slane %v496_v20, 4  ;;  %v506_v32 = vrot.slane %v505_v21, 4  ;;  %v523_v33 = vadd.f32 %v522_v28, %v521_v27  ;;  %v530_v34 = vsel %vm484_vm1, %v477_v18, 0.0  ;;  %v482_v39 = vld [vmem:[%s1923_s1 + $0x78] sm:$0xff] }
  0x83   : > { %v489_v35 = vadd.f32 %v488_v25, %v487_v13  ;;  %v515_v36 = vrot.slane %v514_v26, 4  ;;  %v531_v37 = vsel %vm484_vm1, %v478_v19, 0.0  ;;  %v539_v38 = vsel %vm484_vm1, %v479_v24, 0.0 }
  0x84   : > { %v498_v40 = vadd.f32 %v497_v31, %v496_v20  ;;  %v507_v41 = vadd.f32 %v506_v32, %v505_v21  ;;  %v524_v42 = vrot.slane %v523_v33, 4  ;;  %v532_v43 = vadd.f32 %v531_v37, %v530_v34 }
  0x85   : > { %v490_v44 = vrot.slane %v489_v35, 2  ;;  %v516_v45 = vadd.f32 %v515_v36, %v514_v26  ;;  %v540_v46 = vsel %vm484_vm1, %v480_v29, 0.0  ;;  %v548_v47 = vsel %vm484_vm1, %v481_v30, 0.0  ;;  %v483_v29 = vld [vmem:[#allocation2] sm:$0xff] }
  0x86   : > { %v499_v48 = vrot.slane %v498_v40, 2  ;;  %v508_v49 = vrot.slane %v507_v41, 2  ;;  %v525_v50 = vadd.f32 %v524_v42, %v523_v33  ;;  %v533_v51 = vrot.slane %v532_v43, 4 }
  0x87   : > { %v491_v52 = vadd.f32 %v490_v44, %v489_v35  ;;  %v517_v53 = vrot.slane %v516_v45, 2  ;;  %v541_v54 = vadd.f32 %v540_v46, %v539_v38  ;;  %v549_v55 = vsel %vm484_vm1, %v482_v39, 0.0 }
  0x88   : > { %v500_v56 = vadd.f32 %v499_v48, %v498_v40  ;;  %v509_v57 = vadd.f32 %v508_v49, %v507_v41  ;;  %v526_v58 = vrot.slane %v525_v50, 2  ;;  %v534_v59 = vadd.f32 %v533_v51, %v532_v43 }
  0x89   : > { %v492_v60 = vrot.slane %v491_v52, 1  ;;  %v518_v61 = vadd.f32 %v517_v53, %v516_v45  ;;  %v542_v62 = vrot.slane %v541_v54, 4  ;;  %v550_v63 = vadd.f32 %v549_v55, %v548_v47 }
  0x8a   : > { %v501_v0 = vrot.slane %v500_v56, 1  ;;  %v510_v1 = vrot.slane %v509_v57, 1  ;;  %v527_v2 = vadd.f32 %v526_v58, %v525_v50  ;;  %v535_v3 = vrot.slane %v534_v59, 2 }
  0x8b   : > { %v493_v4 = vadd.f32 %v492_v60, %v491_v52  ;;  %v519_v5 = vrot.slane %v518_v61, 1  ;;  %v543_v6 = vadd.f32 %v542_v62, %v541_v54  ;;  %v551_v7 = vrot.slane %v550_v63, 4 }
  0x8c   : > { %v502_v8 = vadd.f32 %v501_v0, %v500_v56  ;;  %v511_v9 = vadd.f32 %v510_v1, %v509_v57  ;;  %v528_v10 = vrot.slane %v527_v2, 1  ;;  %v536_v11 = vadd.f32 %v535_v3, %v534_v59 }
  0x8d   : > { %v520_v12 = vadd.f32 %v519_v5, %v518_v61  ;;  %v544_v13 = vrot.slane %v543_v6, 2  ;;  %v552_v14 = vadd.f32 %v551_v7, %v550_v63  ;;  %vm569_vm4 = vcmask 1043459  }
  0x8e   : > { %v529_v15 = vadd.f32 %v528_v10, %v527_v2  ;;  %v537_v16 = vrot.slane %v536_v11, 1  ;;  %v566_v17 = vsel %vm565_vm2, %v502_v8, %v493_v4  ;;  %vm571_vm5 = vcmask 1044484  }
  0x8f   : > { %v545_v18 = vadd.f32 %v544_v13, %v543_v6  ;;  %v553_v19 = vrot.slane %v552_v14, 2  ;;  %v568_v20 = vsel %vm567_vm3, %v511_v9, %v566_v17  ;;  %vm573_vm6 = vcmask 1045509  }
  0x90   : > { %v538_v21 = vadd.f32 %v537_v16, %v536_v11  ;;  %v570_v22 = vsel %vm569_vm4, %v520_v12, %v568_v20  ;;  %vm575_vm7 = vcmask 1046534   ;;  %vm577_vm8 = vcmask 1047559  }
  0x91   : > { %v546_v23 = vrot.slane %v545_v18, 1  ;;  %v554_v24 = vadd.f32 %v553_v19, %v552_v14  ;;  %v572_v25 = vsel %vm571_vm5, %v529_v15, %v570_v22 }
  0x92   : > { %v574_v26 = vsel %vm573_vm6, %v538_v21, %v572_v25 }
  0x93   : > { %v547_v27 = vadd.f32 %v546_v23, %v545_v18  ;;  %v555_v28 = vrot.slane %v554_v24, 1 }
  0x95   : > { %v556_v30 = vadd.f32 %v555_v28, %v554_v24  ;;  %v576_v31 = vsel %vm575_vm7, %v547_v27, %v574_v26 }
  0x97   : > { %v578_v32 = vsel %vm577_vm8, %v556_v30, %v576_v31 }
  0x98   : > { %v580_v33 = vadd.f32 %v578_v32, %v483_v29 }
  0x9a   : > { %581 = vst.msk [vmem:[#allocation2] sm:$0xff] %vm484_vm1, %v580_v33 }
  0x9b PF: > { %p1237_p5 = scmp.ne.s32.totalorder %s1717_s12, 1 }
  0x9c   : > { %s1238_s7 = sshll.u32 (!%p1237_p5), %s1717_s12, 4 }
  0x9d   : > { %585 = sbr.rel (%p1237_p5) target bundleno = 1030 (0x406), region = 88 }
  0xa2   : > { %v731_v34 = vld [vmem:[#allocation6 + $0x18] sm:$0xff]  ;;  %v603_v35 = vlaneseq  ;;  %v1739_v36 = vmov 0.0   ;;  %v730_v37 = vld [vmem:[#allocation6 + $0x10] sm:$0xff]  ;;  %vm1740_vm9 = vmmov 0   ;;  %v606_v38 = vstv %s1238_s7  ;;  %v729_v39 = vld [vmem:[#allocation6 + $0x8] sm:$0xff] }
  0xa3   : > { %1308 = vmatprep.subr.mxu0 %v1739_v36  ;;  %1316 = vmatprep.mubr.msk.f32.mxu0 %vm1740_vm9, %v1739_v36  ;;  %v728_v41 = vld [vmem:[#allocation6] sm:$0xff]  ;;  %v588_v43 = vld [vmem:[%s1923_s1 + $0x10] sm:$0xff]  ;;  %v587_v45 = vld [vmem:[%s1923_s1 + $0x8] sm:$0xff]  ;;  %vm628_vm11 = vcmask 261120   ;;  %vm709_vm13 = vcmask 1041409   ;;  %vm711_vm14 = vcmask 1042434  }
  0xa4   : > { %1309 = vmatpush3.msra.mxu0 %v731_v34  ;;  %v604_v40 = vshrl.u32 %v603_v35, 7  ;;  %1319 = vmatprep.subr.mxu1 %v1739_v36  ;;  %v586_v42 = vld [vmem:[%s1923_s1] sm:$0xff]  ;;  %v589_v46 = vld [vmem:[%s1923_s1 + $0x18] sm:$0xff]  ;;  %v591_v47 = vld [vmem:[%s1923_s1 + $0x28] sm:$0xff]  ;;  %vm713_vm15 = vcmask 1043459   ;;  %vm715_vm0 = vcmask 1044484  }
  0xa5   : > { %1310 = vmatprep.subr.mxu0 %v1739_v36  ;;  %v590_v44 = vld [vmem:[%s1923_s1 + $0x20] sm:$0xff]  ;;  %1351 = vmatprep.mubr.msk.f32.mxu1 %vm1740_vm9, %v1739_v36  ;;  %v592_v48 = vld [vmem:[%s1923_s1 + $0x30] sm:$0xff]  ;;  %v593_v49 = vld [vmem:[%s1923_s1 + $0x38] sm:$0xff]  ;;  %vm717_vm1 = vcmask 1045509   ;;  %vm719_vm2 = vcmask 1046534   ;;  %vm721_vm3 = vcmask 1047559  }
  0xa6   : > { %1311 = vmatpush3.msra.mxu0 %v730_v37  ;;  %v594_v50 = vld [vmem:[%s1923_s1 + $0x40] sm:$0xff]  ;;  %v605_v51 = vadd.s32 8, %v604_v40  ;;  %v607_v52 = vadd.s32 %v606_v38, %v604_v40  ;;  %v595_v53 = vld [vmem:[%s1923_s1 + $0x48] sm:$0xff]  ;;  %v596_v54 = vld [vmem:[%s1923_s1 + $0x50] sm:$0xff] }
  0xa7   : > { %1312 = vmatprep.subr.mxu0 %v1739_v36  ;;  %v598_v55 = vld [vmem:[%s1923_s1 + $0x60] sm:$0xff]  ;;  %v597_v56 = vld [vmem:[%s1923_s1 + $0x58] sm:$0xff]  ;;  %v599_v57 = vld [vmem:[%s1923_s1 + $0x68] sm:$0xff] }
  0xa8   : > { %1313 = vmatpush3.msra.mxu0 %v729_v39  ;;  %v600_v58 = vld [vmem:[%s1923_s1 + $0x70] sm:$0xff]  ;;  %v608_v59 = vadd.s32 %v606_v38, %v605_v51  ;;  %vm609_vm10 = vcmp.lt.s32.totalorder %v607_v52, 24  ;;  %v828_v0 = vld [vmem:[#allocation8 + $0x78] sm:$0xff]  ;;  %v826_v10 = vld [vmem:[#allocation8 + $0x68] sm:$0xff] }
  0xa9   : > { %1314 = vmatprep.subr.mxu0 %v1739_v36  ;;  %v611_v60 = vsel %vm609_vm10, %v586_v42, 0.0  ;;  %v613_v61 = vsel %vm609_vm10, %v588_v43, 0.0  ;;  %v615_v62 = vsel %vm609_vm10, %v590_v44, 0.0  ;;  %v617_v63 = vsel %vm609_vm10, %v592_v48, 0.0  ;;  %v827_v1 = vld [vmem:[#allocation8 + $0x70] sm:$0xff]  ;;  %v601_v2 = vld [vmem:[%s1923_s1 + $0x78] sm:$0xff]  ;;  %1320 = vmatpush3.msra.mxu1 %v828_v0 }
  0xaa   : > { %1315 = vmatpush3.msra.mxu0 %v728_v41  ;;  %vm610_vm12 = vcmp.lt.s32.totalorder %v608_v59, 24  ;;  %v619_v3 = vsel %vm609_vm10, %v594_v50, 0.0  ;;  %v621_v4 = vsel %vm609_vm10, %v596_v54, 0.0  ;;  %v623_v5 = vsel %vm609_vm10, %v598_v55, 0.0  ;;  %1321 = vmatprep.subr.mxu1 %v1739_v36  ;;  %v825_v19 = vld [vmem:[#allocation8 + $0x60] sm:$0xff]  ;;  %v824_v28 = vld [vmem:[#allocation8 + $0x58] sm:$0xff] }
  0xab   : > { %v612_v6 = vsel %vm610_vm12, %v587_v45, 0.0  ;;  %v614_v7 = vsel %vm610_vm12, %v589_v46, 0.0  ;;  %v616_v8 = vsel %vm610_vm12, %v591_v47, 0.0  ;;  %v618_v9 = vsel %vm610_vm12, %v593_v49, 0.0  ;;  %1354 = vmatprep.subr.mxu0 %v1739_v36  ;;  %1322 = vmatpush3.msra.mxu1 %v827_v1  ;;  %v823_v38 = vld [vmem:[#allocation8 + $0x50] sm:$0xff]  ;;  %v822_v47 = vld [vmem:[#allocation8 + $0x48] sm:$0xff] }
  0xac   : > { %v620_v11 = vsel %vm610_vm12, %v595_v53, 0.0  ;;  %v622_v12 = vsel %vm610_vm12, %v597_v56, 0.0  ;;  %v624_v13 = vsel %vm610_vm12, %v599_v57, 0.0  ;;  %v625_v14 = vsel %vm609_vm10, %v600_v58, 0.0  ;;  %1323 = vmatprep.subr.mxu1 %v1739_v36  ;;  %v821_v56 = vld [vmem:[#allocation8 + $0x40] sm:$0xff]  ;;  %v820_v1 = vld [vmem:[#allocation8 + $0x38] sm:$0xff] }
  0xad   : > { %v626_v15 = vsel %vm610_vm12, %v601_v2, 0.0  ;;  %v629_v16 = vsel %vm628_vm11, %v611_v60, 0.0  ;;  %v630_v17 = vsel %vm628_vm11, %v612_v6, 0.0  ;;  %v638_v18 = vsel %vm628_vm11, %v613_v61, 0.0  ;;  %1324 = vmatpush3.msra.mxu1 %v826_v10  ;;  %v819_v10 = vld [vmem:[#allocation8 + $0x30] sm:$0xff] }
  0xae   : > { %v631_v20 = vadd.f32 %v630_v17, %v629_v16  ;;  %v639_v21 = vsel %vm628_vm11, %v614_v7, 0.0  ;;  %v647_v22 = vsel %vm628_vm11, %v615_v62, 0.0  ;;  %v648_v23 = vsel %vm628_vm11, %v616_v8, 0.0  ;;  %1325 = vmatprep.subr.mxu1 %v1739_v36 }
  0xaf   : > { %v640_v24 = vadd.f32 %v639_v21, %v638_v18  ;;  %v649_v25 = vadd.f32 %v648_v23, %v647_v22  ;;  %v656_v26 = vsel %vm628_vm11, %v617_v63, 0.0  ;;  %v657_v27 = vsel %vm628_vm11, %v618_v9, 0.0  ;;  %1326 = vmatpush3.msra.mxu1 %v825_v19  ;;  %v818_v19 = vld [vmem:[#allocation8 + $0x28] sm:$0xff] }
  0xb0   : > { %v632_v29 = vrot.slane %v631_v20, 4  ;;  %v658_v30 = vadd.f32 %v657_v27, %v656_v26  ;;  %v665_v31 = vsel %vm628_vm11, %v619_v3, 0.0  ;;  %v666_v32 = vsel %vm628_vm11, %v620_v11, 0.0  ;;  %1327 = vmatprep.subr.mxu1 %v1739_v36  ;;  %v817_v26 = vld [vmem:[#allocation8 + $0x20] sm:$0xff] }
  0xb1   : > { %v641_v33 = vrot.slane %v640_v24, 4  ;;  %v650_v34 = vrot.slane %v649_v25, 4  ;;  %v667_v35 = vadd.f32 %v666_v32, %v665_v31  ;;  %v674_v37 = vsel %vm628_vm11, %v621_v4, 0.0  ;;  %1328 = vmatpush3.msra.mxu1 %v824_v28  ;;  %v816_v32 = vld [vmem:[#allocation8 + $0x18] sm:$0xff] }
  0xb2   : > { %v633_v39 = vadd.f32 %v632_v29, %v631_v20  ;;  %v659_v40 = vrot.slane %v658_v30, 4  ;;  %v675_v41 = vsel %vm628_vm11, %v622_v12, 0.0  ;;  %v683_v42 = vsel %vm628_vm11, %v623_v5, 0.0  ;;  %1329 = vmatprep.subr.mxu1 %v1739_v36 }
  0xb3   : > { %v642_v43 = vadd.f32 %v641_v33, %v640_v24  ;;  %v651_v44 = vadd.f32 %v650_v34, %v649_v25  ;;  %v668_v45 = vrot.slane %v667_v35, 4  ;;  %v676_v46 = vadd.f32 %v675_v41, %v674_v37  ;;  %1330 = vmatpush3.msra.mxu1 %v823_v38 }
  0xb4   : > { %v634_v48 = vrot.slane %v633_v39, 2  ;;  %v660_v49 = vadd.f32 %v659_v40, %v658_v30  ;;  %v684_v50 = vsel %vm628_vm11, %v624_v13, 0.0  ;;  %v692_v51 = vsel %vm628_vm11, %v625_v14, 0.0  ;;  %1331 = vmatprep.subr.mxu1 %v1739_v36  ;;  %v627_v40 = vld [vmem:[#allocation2] sm:$0xff] }
  0xb5   : > { %v643_v52 = vrot.slane %v642_v43, 2  ;;  %v652_v53 = vrot.slane %v651_v44, 2  ;;  %v669_v54 = vadd.f32 %v668_v45, %v667_v35  ;;  %v677_v55 = vrot.slane %v676_v46, 4  ;;  %1332 = vmatpush3.msra.mxu1 %v822_v47  ;;  %v815_v47 = vld [vmem:[#allocation8 + $0x10] sm:$0xff] }
  0xb6   : > { %v635_v57 = vadd.f32 %v634_v48, %v633_v39  ;;  %v661_v58 = vrot.slane %v660_v49, 2  ;;  %v685_v59 = vadd.f32 %v684_v50, %v683_v42  ;;  %v693_v60 = vsel %vm628_vm11, %v626_v15, 0.0  ;;  %1333 = vmatprep.subr.mxu1 %v1739_v36  ;;  %v814_v48 = vld [vmem:[#allocation8 + $0x8] sm:$0xff]  ;;  %v922_v50 = vld [vmem:[#allocation9 + $0x78] sm:$0xff] }
  0xb7   : > { %v644_v61 = vadd.f32 %v643_v52, %v642_v43  ;;  %v653_v62 = vadd.f32 %v652_v53, %v651_v44  ;;  %v670_v63 = vrot.slane %v669_v54, 2  ;;  %v678_v0 = vadd.f32 %v677_v55, %v676_v46  ;;  %1334 = vmatpush3.msra.mxu1 %v821_v56  ;;  %v920_v52 = vld [vmem:[#allocation9 + $0x68] sm:$0xff]  ;;  %v919_v53 = vld [vmem:[#allocation9 + $0x60] sm:$0xff]  ;;  %v917_v55 = vld [vmem:[#allocation9 + $0x50] sm:$0xff] }
  0xb8   : > { %v636_v2 = vrot.slane %v635_v57, 1  ;;  %v662_v3 = vadd.f32 %v661_v58, %v660_v49  ;;  %v686_v4 = vrot.slane %v685_v59, 4  ;;  %v694_v5 = vadd.f32 %v693_v60, %v692_v51  ;;  %1335 = vmatprep.subr.mxu1 %v1739_v36  ;;  %v813_v49 = vld [vmem:[#allocation8] sm:$0xff]  ;;  %v921_v51 = vld [vmem:[#allocation9 + $0x70] sm:$0xff]  ;;  %v916_v56 = vld [vmem:[#allocation9 + $0x48] sm:$0xff] }
  0xb9   : > { %v645_v6 = vrot.slane %v644_v61, 1  ;;  %v654_v7 = vrot.slane %v653_v62, 1  ;;  %v671_v8 = vadd.f32 %v670_v63, %v669_v54  ;;  %v679_v9 = vrot.slane %v678_v0, 2  ;;  %1336 = vmatpush3.msra.mxu1 %v820_v1  ;;  %v918_v54 = vld [vmem:[#allocation9 + $0x58] sm:$0xff]  ;;  %v912_v60 = vld [vmem:[#allocation9 + $0x28] sm:$0xff] }
  0xba   : > { %v637_v11 = vadd.f32 %v636_v2, %v635_v57  ;;  %v663_v12 = vrot.slane %v662_v3, 1  ;;  %v687_v13 = vadd.f32 %v686_v4, %v685_v59  ;;  %v695_v14 = vrot.slane %v694_v5, 4  ;;  %1337 = vmatprep.subr.mxu1 %v1739_v36  ;;  %v915_v57 = vld [vmem:[#allocation9 + $0x40] sm:$0xff]  ;;  %v914_v58 = vld [vmem:[#allocation9 + $0x38] sm:$0xff]  ;;  %v913_v59 = vld [vmem:[#allocation9 + $0x30] sm:$0xff] }
  0xbb   : > { %v646_v15 = vadd.f32 %v645_v6, %v644_v61  ;;  %v655_v16 = vadd.f32 %v654_v7, %v653_v62  ;;  %v672_v17 = vrot.slane %v671_v8, 1  ;;  %v680_v18 = vadd.f32 %v679_v9, %v678_v0  ;;  %1338 = vmatpush3.msra.mxu1 %v819_v10  ;;  %v911_v61 = vld [vmem:[#allocation9 + $0x20] sm:$0xff]  ;;  %v910_v62 = vld [vmem:[#allocation9 + $0x18] sm:$0xff]  ;;  %v909_v4 = vld [vmem:[#allocation9 + $0x10] sm:$0xff] }
  0xbc   : > { %v664_v20 = vadd.f32 %v663_v12, %v662_v3  ;;  %v688_v21 = vrot.slane %v687_v13, 2  ;;  %v696_v22 = vadd.f32 %v695_v14, %v694_v5  ;;  %1339 = vmatprep.subr.mxu1 %v1739_v36  ;;  %v1239_v63 = vld [vmem:[%s2137_s2] ss:$0 sm:$0xff]  ;;  %v908_v5 = vld [vmem:[#allocation9 + $0x8] sm:$0xff]  ;;  %v907_v6 = vld [vmem:[#allocation9] sm:$0xff] }
  0xbd   : > { %v673_v23 = vadd.f32 %v672_v17, %v671_v8  ;;  %v681_v24 = vrot.slane %v680_v18, 1  ;;  %v710_v25 = vsel %vm709_vm13, %v646_v15, %v637_v11  ;;  %1340 = vmatpush3.msra.mxu1 %v818_v19  ;;  %v1016_v7 = vld [vmem:[#allocation11 + $0x78] sm:$0xff]  ;;  %v1015_v8 = vld [vmem:[#allocation11 + $0x70] sm:$0xff]  ;;  %v1014_v9 = vld [vmem:[#allocation11 + $0x68] sm:$0xff] }
  0xbe   : > { %v689_v27 = vadd.f32 %v688_v21, %v687_v13  ;;  %v697_v28 = vrot.slane %v696_v22, 2  ;;  %v712_v29 = vsel %vm711_vm14, %v655_v16, %v710_v25  ;;  %1341 = vmatprep.subr.mxu1 %v1739_v36  ;;  %v1013_v10 = vld [vmem:[#allocation11 + $0x60] sm:$0xff]  ;;  %v1012_v11 = vld [vmem:[#allocation11 + $0x58] sm:$0xff]  ;;  %v1011_v12 = vld [vmem:[#allocation11 + $0x50] sm:$0xff] }
  0xbf   : > { %v682_v30 = vadd.f32 %v681_v24, %v680_v18  ;;  %v714_v31 = vsel %vm713_vm15, %v664_v20, %v712_v29  ;;  %1342 = vmatpush3.msra.mxu1 %v817_v26  ;;  %v1010_v13 = vld [vmem:[#allocation11 + $0x48] sm:$0xff]  ;;  %v1009_v14 = vld [vmem:[#allocation11 + $0x40] sm:$0xff]  ;;  %v1008_v15 = vld [vmem:[#allocation11 + $0x38] sm:$0xff] }
  0xc0   : > { %v690_v33 = vrot.slane %v689_v27, 1  ;;  %v698_v34 = vadd.f32 %v697_v28, %v696_v22  ;;  %v716_v35 = vsel %vm715_vm0, %v673_v23, %v714_v31  ;;  %1343 = vmatprep.subr.mxu1 %v1739_v36  ;;  %v1007_v16 = vld [vmem:[#allocation11 + $0x30] sm:$0xff]  ;;  %v1006_v17 = vld [vmem:[#allocation11 + $0x28] sm:$0xff]  ;;  %v1005_v18 = vld [vmem:[#allocation11 + $0x20] sm:$0xff] }
  0xc1   : > { %v718_v37 = vsel %vm717_vm1, %v682_v30, %v716_v35  ;;  %1344 = vmatpush3.msra.mxu1 %v816_v32  ;;  %v1004_v19 = vld [vmem:[#allocation11 + $0x18] sm:$0xff]  ;;  %v1003_v25 = vld [vmem:[#allocation11 + $0x10] sm:$0xff]  ;;  %v1002_v26 = vld [vmem:[#allocation11 + $0x8] sm:$0xff] }
  0xc2   : > { %v691_v38 = vadd.f32 %v690_v33, %v689_v27  ;;  %v699_v39 = vrot.slane %v698_v34, 1  ;;  %1345 = vmatprep.subr.mxu1 %v1739_v36  ;;  %v1241_v20 = vld [vmem:[%s2139_s4] ss:$0 sm:$0xff]  ;;  %v1001_v27 = vld [vmem:[#allocation11] sm:$0xff] }
  0xc3   : > { %1346 = vmatpush3.msra.mxu1 %v815_v47  ;;  %v1242_v28 = vld [vmem:[%s2141_s6] ss:$0 sm:$0xff] }
  0xc4   : > { %v700_v41 = vadd.f32 %v699_v39, %v698_v34  ;;  %v720_v42 = vsel %vm719_vm2, %v691_v38, %v718_v37  ;;  %1347 = vmatprep.subr.mxu1 %v1739_v36  ;;  %v1243_v33 = vld [vmem:[%s2143_s8] ss:$0 sm:$0xff] }
  0xc5   : > { %1348 = vmatpush3.msra.mxu1 %v814_v48 }
  0xc6   : > { %v722_v43 = vsel %vm721_vm3, %v700_v41, %v720_v42  ;;  %1349 = vmatprep.subr.mxu1 %v1739_v36 }
  0xc7   : > { %v724_v44 = vadd.f32 %v722_v43, %v627_v40  ;;  %1350 = vmatpush3.msra.mxu1 %v813_v49 }
  0xc8   : > { %1389 = vmatprep.subr.mxu1 %v1739_v36 }
  0xc9   : > { %725 = vst.msk [vmem:[#allocation2] sm:$0xff] %vm628_vm11, %v724_v44 }
  0xd0   : > { %v726_v45 = vld [vmem:[#allocation2] sm:$0xff] }
  0xd1   : > { %v727_v46 = vmul.f32 0.041666668, %v726_v45 }
  0xd3   : > { %1317 = vmatmul.mubr.msk.f32.vlgmr.msra.gmra.mxu0 %vm628_vm11, %v727_v46 }
  0xd4   : > { %1386 = vmatprep.mubr.msk.f32.mxu0 %vm1740_vm9, %v1739_v36  ;;  %1355 = vmatpush3.msra.mxu0 %v922_v50 }
  0xd5   : > { %1356 = vmatprep.subr.mxu0 %v1739_v36 }
  0xd6   : > { %1357 = vmatpush3.msra.mxu0 %v921_v51 }
  0xd7   : > { %1358 = vmatprep.subr.mxu0 %v1739_v36 }
  0xd8   : > { %1359 = vmatpush3.msra.mxu0 %v920_v52 }
  0xd9   : > { %1360 = vmatprep.subr.mxu0 %v1739_v36 }
  0xda   : > { %1361 = vmatpush3.msra.mxu0 %v919_v53 }
  0xdb   : > { %1362 = vmatprep.subr.mxu0 %v1739_v36 }
  0xdc   : > { %1363 = vmatpush3.msra.mxu0 %v918_v54 }
  0xdd   : > { %1364 = vmatprep.subr.mxu0 %v1739_v36 }
  0xde   : > { %1365 = vmatpush3.msra.mxu0 %v917_v55 }
  0xdf   : > { %1366 = vmatprep.subr.mxu0 %v1739_v36 }
  0xe0   : > { %1367 = vmatpush3.msra.mxu0 %v916_v56 }
  0xe1   : > { %1368 = vmatprep.subr.mxu0 %v1739_v36 }
  0xe2   : > { %1369 = vmatpush3.msra.mxu0 %v915_v57 }
  0xe3   : > { %1370 = vmatprep.subr.mxu0 %v1739_v36 }
  0xe4   : > { %1371 = vmatpush3.msra.mxu0 %v914_v58 }
  0xe5   : > { %1372 = vmatprep.subr.mxu0 %v1739_v36 }
  0xe6   : > { %1373 = vmatpush3.msra.mxu0 %v913_v59 }
  0xe7   : > { %1374 = vmatprep.subr.mxu0 %v1739_v36 }
  0xe8   : > { %1375 = vmatpush3.msra.mxu0 %v912_v60 }
  0xe9   : > { %1376 = vmatprep.subr.mxu0 %v1739_v36 }
  0xea   : > { %1377 = vmatpush3.msra.mxu0 %v911_v61 }
  0xeb   : > { %1378 = vmatprep.subr.mxu0 %v1739_v36 }
  0xec   : > { %1379 = vmatpush3.msra.mxu0 %v910_v62 }
  0xed   : > { %1380 = vmatprep.subr.mxu0 %v1739_v36 }
  0xee   : > { %1381 = vmatpush3.msra.mxu0 %v909_v4 }
  0xef   : > { %1382 = vmatprep.subr.mxu0 %v1739_v36 }
  0xf0   : > { %1383 = vmatpush3.msra.mxu0 %v908_v5 }
  0xf1   : > { %1384 = vmatprep.subr.mxu0 %v1739_v36 }
  0xf2   : > { %1385 = vmatpush3.msra.mxu0 %v907_v6 }
 0x193   : > { %v808_v0 = vpop.f32.mrf.mxu0 }
 0x194   : > { %v809_v1 = vadd.f32 %v1239_v63, %v808_v0 }
 0x195   : > { %v1318_v2 = vpop.f32.mrf.mxu0 }
 0x196   : > { %v812_v3 = vmax.f32 %v809_v1, 0.0 }
 0x198   : > { %1352 = vmatmul.mubr.f32.vlgmr.msra.gmra.mxu1 %v812_v3 }
 0x199   : > { %1421 = vmatprep.mubr.msk.f32.mxu1 %vm1740_vm9, %v1739_v36  ;;  %1390 = vmatpush3.msra.mxu1 %v1016_v7 }
 0x19a   : > { %1391 = vmatprep.subr.mxu1 %v1739_v36 }
 0x19b   : > { %1392 = vmatpush3.msra.mxu1 %v1015_v8 }
 0x19c   : > { %1393 = vmatprep.subr.mxu1 %v1739_v36 }
 0x19d   : > { %1394 = vmatpush3.msra.mxu1 %v1014_v9 }
 0x19e   : > { %1395 = vmatprep.subr.mxu1 %v1739_v36 }
 0x19f   : > { %1396 = vmatpush3.msra.mxu1 %v1013_v10 }
 0x1a0   : > { %1397 = vmatprep.subr.mxu1 %v1739_v36 }
 0x1a1   : > { %1398 = vmatpush3.msra.mxu1 %v1012_v11 }
 0x1a2   : > { %1399 = vmatprep.subr.mxu1 %v1739_v36 }
 0x1a3   : > { %1400 = vmatpush3.msra.mxu1 %v1011_v12 }
 0x1a4   : > { %1401 = vmatprep.subr.mxu1 %v1739_v36 }
 0x1a5   : > { %1402 = vmatpush3.msra.mxu1 %v1010_v13 }
 0x1a6   : > { %1403 = vmatprep.subr.mxu1 %v1739_v36 }
 0x1a7   : > { %1404 = vmatpush3.msra.mxu1 %v1009_v14 }
 0x1a8   : > { %1405 = vmatprep.subr.mxu1 %v1739_v36 }
 0x1a9   : > { %1406 = vmatpush3.msra.mxu1 %v1008_v15 }
 0x1aa   : > { %1407 = vmatprep.subr.mxu1 %v1739_v36 }
 0x1ab   : > { %1408 = vmatpush3.msra.mxu1 %v1007_v16 }
 0x1ac   : > { %1409 = vmatprep.subr.mxu1 %v1739_v36 }
 0x1ad   : > { %1410 = vmatpush3.msra.mxu1 %v1006_v17 }
 0x1ae   : > { %1411 = vmatprep.subr.mxu1 %v1739_v36 }
 0x1af   : > { %1412 = vmatpush3.msra.mxu1 %v1005_v18 }
 0x1b0   : > { %1413 = vmatprep.subr.mxu1 %v1739_v36 }
 0x1b1   : > { %1414 = vmatpush3.msra.mxu1 %v1004_v19 }
 0x1b2   : > { %1415 = vmatprep.subr.mxu1 %v1739_v36 }
 0x1b3   : > { %1416 = vmatpush3.msra.mxu1 %v1003_v25 }
 0x1b4   : > { %1417 = vmatprep.subr.mxu1 %v1739_v36 }
 0x1b5   : > { %1418 = vmatpush3.msra.mxu1 %v1002_v26 }
 0x1b6   : > { %1419 = vmatprep.subr.mxu1 %v1739_v36 }
 0x1b7   : > { %1420 = vmatpush3.msra.mxu1 %v1001_v27 }
 0x258   : > { %v902_v21 = vpop.f32.mrf.mxu1 }
 0x259   : > { %v903_v22 = vadd.f32 %v1241_v20, %v902_v21 }
 0x25a   : > { %v1353_v23 = vpop.f32.mrf.mxu1 }
 0x25b   : > { %v906_v24 = vmax.f32 %v903_v22, 0.0 }
 0x25d   : > { %1387 = vmatmul.mubr.f32.vlgmr.msra.gmra.mxu0 %v906_v24 }
 0x31d   : > { %v996_v29 = vpop.f32.mrf.mxu0 }
 0x31e   : > { %v997_v30 = vadd.f32 %v1242_v28, %v996_v29 }
 0x31f   : > { %v1388_v31 = vpop.f32.mrf.mxu0 }
 0x320   : > { %v1000_v32 = vmax.f32 %v997_v30, 0.0 }
 0x322   : > { %1422 = vmatmul.mubr.f32.vlgmr.msra.gmra.mxu1 %v1000_v32 }
 0x3e2   : > { %v1090_v34 = vpop.f32.mrf.mxu1 }
 0x3e3   : > { %v1091_v35 = vadd.f32 %v1243_v33, %v1090_v34 }
 0x3e4   : > { %v1423_v37 = vpop.f32.mrf.mxu1 }
 0x3e5   : > { %v1244_v38 = vmul.f32 -1.442695, %v1091_v35 }
 0x3e7   : > { %1531 = vpow2.f32 %v1244_v38 }
 0x3f4   : > { %v1532_v36 = vpop.eup %1531 }
 0x3f5   : > { %v1097_v39 = vadd.f32 1.0, %v1532_v36 }
 0x3f7   : > { %1533 = vrcp.f32 %v1097_v39 }
 0x404   : > { %v1534_v40 = vpop.eup %1533 }
 0x405   : > { %1100 = vst [vmem:[#allocation12] sm:$0xff] %v1534_v40 }
 0x406 PF: > { %s2163_s17 = sadd.s32 4294967295, %s1725_s14   ;;  %s1741_s16 = smov [#allocation12]  }
 0x407   : > { %p2102_p10 = scmp.eq.s32.totalorder %s2163_s17, 1  ;;  %s1110_s29 = sshll.u32 %s1741_s16, 4  ;;  %s1111_s29 = int_to_ptr.vmem [resolvable:$true] %s1110_s29 }
 0x408   : > { %s1639_s19 = scalar_lea.vmem %s1111_s29, 128  ;;  %p1646_p1 = scmp.lt.s32.totalorder %s1111_s29, %s1111_s29 }
 0x409   : > { %p1640_p7 = scmp.ne.s32.totalorder %s1111_s29, %s1639_s19  ;;  %p1647_p0 = scmp.lt.s32.totalorder %s1639_s19, %s1639_s19 }
 0x40b   : > { %p1641_p9 = pnand %p1640_p7, %p2102_p10  ;;  %p1648_p2 = por %p1647_p0, %p1646_p1 }
 0x40d   : > { %p1642_p11 = pneg %p1641_p9 }
 0x40f   : > { %p1649_p4 = pnand %p1648_p2, %p1642_p11 }
 0x411   : > { %1652 = shalt.err (!%p1649_p4)
}
 0x412   : > { %1442 = dma.vmem_to_hbm [thread:$0]  (%p2102_p10), %s1111_s29, 128, %s2144_s9, [#allocation5]  }
 0x413   : > { %1700 = dma.done.wait (%p2102_p10), [#allocation5], 128  }
 0x414   : > { %1702 = vsyncadd (%p2102_p10), [#allocation5], 4294967168 }
 0x415 PF: > { %s25_s14 = sadd.s32 1, %s1725_s14   ;;  %s2165_s12 = sld [smem:[#allocation19_spill]] }
 0x416   : > { %p22_p6 = scmp.ge.s32.totalorder %s25_s14, 4   ;;  %s2166_s13 = sld [smem:[#allocation20_spill]] }
 0x417   : > { %s2167_s30 = smov %s1709_s10  ;;  %s2168_s10 = smov %s1713_s11 }
 0x418   : > { %s2169_s11 = smov %s1850_s22  ;;  %24 = sbr.rel (!%p22_p6) target bundleno = 12 (0xc), region = 127 }
 0x41d   :  { %1123 = vsyncpa [#allocation4], 1 }
 0x41e   :  { %1125 = vsyncpa [#allocation4 + $0x1], 1 }
 0x41f   :  { %1126 = vsyncpa [#allocation7], 1 }
 0x420   :  { %1127 = vsyncpa [#allocation10], 1 }
 0x421   :  { %1128 = vsyncpa [#allocation5], 1 }
 0x422   :  { %1130 = vsyncpa [#allocation5 + $0x1], 1 }

// kernel: tpu_custom_call.1
= control target key start
LH: loop header
LB: loop body
LE: loop exit
PB: predicated region body
PF: predicated region fallthrough
CT: control target
= control target key end

     0   :  { %s2135_s0 = inlined_call_operand.hbm [shape: f32[8,24,32], index: 0, kind: input, shape index: {}]   ;;  %s2136_s1 = inlined_call_operand.hbm [shape: f32[32,128], index: 1, kind: input, shape index: {}]   ;;  %s2137_s2 = inlined_call_operand.vmem [shape: f32[1,128], index: 2, kind: input, shape index: {}]   ;;  %s2138_s3 = inlined_call_operand.hbm [shape: f32[128,128], index: 3, kind: input, shape index: {}]   ;;  %s2139_s4 = inlined_call_operand.vmem [shape: f32[1,128], index: 4, kind: input, shape index: {}]   ;;  %s2140_s5 = inlined_call_operand.hbm [shape: f32[128,128], index: 5, kind: input, shape index: {}]   ;;  %s2141_s6 = inlined_call_operand.vmem [shape: f32[1,128], index: 6, kind: input, shape index: {}]   ;;  %s2142_s7 = inlined_call_operand.hbm [shape: f32[128,128], index: 7, kind: input, shape index: {}]   ;;  %s2143_s8 = inlined_call_operand.vmem [shape: f32[1,128], index: 8, kind: input, shape index: {}]   ;;  %s2144_s9 = inlined_call_operand.hbm [shape: f32[8,128], index: 9, kind: output, shape index: {}]  }
   0x1   :  { %2148 = sst [smem:[#allocation21_spill]] %s2136_s1 }
   0x2   :  { %2149 = sst [smem:[#allocation22_spill]] %s2138_s3 }
   0x3   :  { %2150 = sst [smem:[#allocation23_spill]] %s2140_s5 }
   0x4   :  { %2151 = sst [smem:[#allocation24_spill]] %s2142_s7 }
   0x5   :  { %14 = vsyncpa [#allocation4], 0 }
   0x6   :  { %16 = vsyncpa [#allocation4 + $0x1], 0 }
   0x7   :  { %17 = vsyncpa [#allocation7], 0 }
   0x8   :  { %18 = vsyncpa [#allocation10], 0 }
   0x9   :  { %19 = vsyncpa [#allocation5], 0  ;;  %s1792_s30 = smov 0   ;;  %s1794_s10 = smov 0  }
   0xa   :  { %s1796_s11 = smov 0   ;;  %s1798_s12 = smov 0  }
   0xb   :  { %s1800_s13 = smov 0   ;;  %s1802_s14 = smov 0  }
   0xc LB: > { %2152 = sst [smem:[#allocation19_spill]] %s1721_s13  ;;  %s2145_s15 = sadd.s32 4294967295, %s1725_s14   ;;  %s1725_s14 = sphi %s1802_s14, %s25_s14   ;;  %s1721_s13 = sphi %s1800_s13, %s2166_s13   ;;  %s1717_s12 = sphi %s1798_s12, %s2165_s12   ;;  %s1713_s11 = sphi %s1796_s11, %s2169_s11   ;;  %s1709_s10 = sphi %s1794_s10, %s2168_s10   ;;  %s1705_s30 = sphi %s1792_s30, %s2167_s30  }
   0xd   : > { %s34_s16 = sadd.s32 1, %s1721_s13  ;;  %s46_s17 = sadd.s32 1, %s1713_s11 }
   0xe   : > { %p35_p0 = scmp.ge.s32.totalorder %s34_s16, 2  ;;  %p53_p1 = scmp.ne.s32.totalorder %s1713_s11, %s1709_s10 }
   0xf   : > { %p54_p2 = scmp.eq.s32.totalorder %s1725_s14, 0  ;;  %p59_p4 = scmp.ne.s32.totalorder %s1709_s10, %s1705_s30 }
  0x10   : > { %s2171_s16 = smov (%p35_p0, %s34_s16), 0  ;;  %p1837_p5 = scmp.eq.s32.totalorder %s2145_s15, 0 }
  0x11   : > { %2153 = sst [smem:[#allocation20_spill]] %s2171_s16  ;;  %p1828_p3 = por %p54_p2, %p53_p1 }
  0x12   : > { %s42_s19 = ssub.s32 %s1721_s13, %s2171_s16  ;;  %p1213_p7 = scmp.ge.s32.totalorder %s1725_s14, 1 }
  0x13   : > { %p44_p6 = scmp.eq.s32.totalorder %s42_s19, 0  ;;  %p1844_p8 = por %p1837_p5, %p59_p4 }
  0x14   : > { %p264_p9 = scmp.lt.s32.totalorder %s1725_s14, 3  ;;  %s1727_s24 = smov [#allocation6]  }
  0x15   : > { %s1850_s22 = scalar_select %p44_p6, %s1713_s11, %s46_s17  }
  0x16   : > { %p1852_p10 = pnand %p1213_p7, %p264_p9  ;;  %s276_s25 = sshll.u32 %s1727_s24, 4  ;;  %s277_s25 = int_to_ptr.vmem [resolvable:$true] %s276_s25 }
  0x17   : > { %s1728_s27 = smov [#allocation9]   ;;  %s1546_s29 = scalar_lea.vmem %s277_s25, 512 }
  0x18   : > { %p1445_p11 = pneg %p1852_p10  ;;  %s308_s28 = sshll.u32 %s1728_s27, 4  ;;  %s309_s28 = int_to_ptr.vmem [resolvable:$true] %s308_s28 }
  0x19   : > { %p1547_p0 = scmp.ne.s32.totalorder %s277_s25, %s1546_s29  ;;  %p1554_p4 = scmp.lt.s32.totalorder %s277_s25, %s277_s25 }
  0x1a   : > { %p1860_p12 = pnand %p1445_p11, %p1837_p5  ;;  %p1555_p6 = scmp.lt.s32.totalorder %s1546_s29, %s1546_s29 }
  0x1c   : > { %p1537_p13 = pneg %p1860_p12  ;;  %p1556_p7 = por %p1555_p6, %p1554_p4 }
  0x1e   : > { %p1549_p1 = pnand %p1547_p0, %p1537_p13 }
  0x20   : > { %p1550_p2 = pneg %p1549_p1 }
  0x22   : > { %p1557_p9 = pnand %p1556_p7, %p1550_p2 }
  0x24   : > { %1560 = shalt.err (!%p1557_p9)
}
  0x25   : > { %s1729_s30 = smov 128   ;;  %s1730_s17 = smov 8  }
  0x26   : > { %s2159_s1 = sld [smem:[#allocation21_spill]]  ;;  %s1572_s27 = scalar_lea.vmem %s309_s28, 2048 }
  0x27   : > { %p1573_p11 = scmp.ne.s32.totalorder %s309_s28, %s1572_s27  ;;  %p1580_p2 = scmp.lt.s32.totalorder %s309_s28, %s309_s28 }
  0x28   : > { %p1581_p4 = scmp.lt.s32.totalorder %s1572_s27, %s1572_s27 }
  0x29   : > { %p1575_p0 = pnand %p1573_p11, %p1537_p13 }
  0x2a   : > { %p1582_p6 = por %p1581_p4, %p1580_p2 }
  0x2b   : > { %p1576_p1 = pneg %p1575_p0 }
  0x2c   : > { %1448 = dma.hbm_to_vmem [thread:$0]  (!%p1860_p12), %s2159_s1, 512, %s277_s25, [#allocation7], %s1729_s30, %s1729_s30, %s1730_s17  }
  0x2d   : > { %p1583_p7 = pnand %p1582_p6, %p1576_p1 }
  0x2f   : > { %1586 = shalt.err (!%p1583_p7)
}
  0x30   : > { %s2160_s5 = sld [smem:[#allocation23_spill]]  ;;  %s1731_s25 = smov [#allocation8]  }
  0x31   : > { %s292_s19 = sshll.u32 %s1731_s25, 4  ;;  %s1732_s24 = smov [#allocation11]   ;;  %s293_s19 = int_to_ptr.vmem [resolvable:$true] %s292_s19 }
  0x32   : > { %s324_s1 = sshll.u32 %s1732_s24, 4  ;;  %s1598_s16 = scalar_lea.vmem %s293_s19, 2048  ;;  %s325_s1 = int_to_ptr.vmem [resolvable:$true] %s324_s1 }
  0x33   : > { %p1599_p9 = scmp.ne.s32.totalorder %s293_s19, %s1598_s16  ;;  %p1606_p1 = scmp.lt.s32.totalorder %s293_s19, %s293_s19 }
  0x34   : > { %p1607_p2 = scmp.lt.s32.totalorder %s1598_s16, %s1598_s16 }
  0x35   : > { %p1601_p11 = pnand %p1599_p9, %p1537_p13 }
  0x36   : > { %1454 = dma.hbm_to_vmem [thread:$0]  (!%p1860_p12), %s2160_s5, 2048, %s309_s28, [#allocation10], %s1729_s30, %s1729_s30, %s1730_s17  }
  0x37   : > { %p1602_p0 = pneg %p1601_p11  ;;  %p1608_p4 = por %p1607_p2, %p1606_p1 }
  0x39   : > { %p1609_p6 = pnand %p1608_p4, %p1602_p0 }
  0x3b   : > { %1612 = shalt.err (!%p1609_p6)
}
  0x3c   : > { %s2161_s3 = sld [smem:[#allocation22_spill]]  ;;  %s1624_s27 = scalar_lea.vmem %s325_s1, 2048 }
  0x3d   : > { %p1625_p7 = scmp.ne.s32.totalorder %s325_s1, %s1624_s27  ;;  %p1632_p1 = scmp.lt.s32.totalorder %s325_s1, %s325_s1 }
  0x3e   : > { %p1633_p0 = scmp.lt.s32.totalorder %s1624_s27, %s1624_s27 }
  0x3f   : > { %p1627_p9 = pnand %p1625_p7, %p1537_p13 }
  0x40   : > { %p1634_p2 = por %p1633_p0, %p1632_p1 }
  0x41   : > { %p1628_p11 = pneg %p1627_p9 }
  0x42   : > { %1451 = dma.hbm_to_vmem [thread:$0]  (!%p1860_p12), %s2161_s3, 2048, %s293_s19, [#allocation7], %s1729_s30, %s1729_s30, %s1730_s17  }
  0x43   : > { %p1635_p4 = pnand %p1634_p2, %p1628_p11 }
  0x45   : > { %1638 = shalt.err (!%p1635_p4)
}
  0x46   : > { %s2162_s7 = sld [smem:[#allocation24_spill]]  ;;  %p1218_p6 = scmp.ge.s32.totalorder %s1725_s14, 2 }
  0x48   : > { %337 = sbr.rel (%p1218_p6) target bundleno = 99 (0x63), region = 48 }
  0x4c   : > { %1457 = dma.hbm_to_vmem [thread:$0]  (!%p1860_p12), %s2162_s7, 2048, %s325_s1, [#allocation10], %s1729_s30, %s1729_s30, %s1730_s17  }
  0x4d   : > { %340 = sbr.rel (!%p1828_p3) target bundleno = 99 (0x63), region = 52 }
  0x52   : > { %s341_s25 = sand.u32 1, %s1713_s11   ;;  %s1220_s19 = sshll.u32 %s1721_s13, 1 }
  0x53   : > { %s1219_s24 = sshll.u32 %s341_s25, 7  ;;  %s348_s15 = ssub.s32 3, %s1220_s19 }
  0x54   : > { %p349_p13 = scmp.lt.s32.totalorder %s348_s15, 2  ;;  %s342_s27 = scalar_lea.sflag [#allocation4], %s341_s25 }
  0x55   : > { %s345_s3 = scalar_lea.vmem [#allocation3], %s1219_s24 }
  0x56   : > { %s2173_s15 = smov (!%p349_p13, %s348_s15), 2 }
  0x57   : > { %s1221_s26 = sshll.u32 %s2173_s15, 10 }
  0x58   : > { %s353_s28 = ssub.s32 2048, %s1221_s26 }
  0x59   : > { %354 = vsyncadd %s342_s27, %s353_s28  ;;  %p1222_p12 = scmp.ne.s32.totalorder %s1221_s26, 0  ;;  %s1249_s1 = sshll.u32 %s1721_s13, 8 }
  0x5a   : > { %s359_s18 = scalar_lea.hbm %s2135_s0, %s1249_s1  ;;  %s366_s16 = sld [smem:[#allocation0]]  }
  0x5b   : > { %s374_s29 = sshll.u32 %s345_s3, 4  ;;  %s1733_s5 = smov 384   ;;  %s375_s29 = int_to_ptr.vmem [resolvable:$true] %s374_s29 }
  0x5c   : > { %381 = sst [smem:[#allocation14]] %s1733_s5  ;;  %s1734_s19 = smov 256  }
  0x5d   : > { %385 = sst [smem:[#allocation14 + $0x2]] %s2173_s15  ;;  %s1735_s7 = smov 128  }
  0x5e   : > { %383 = sst [smem:[#allocation14 + $0x1]] %s1734_s19  ;;  %s1736_s28 = smov 8  }
  0x5f   : > { %387 = sst [smem:[#allocation14 + $0x3]] %s1735_s7  ;;  %s1737_s13 = smov 131072  }
  0x60   : > { %s1226_s25 = sshll.u32 %s366_s16, 26  ;;  %389 = sst [smem:[#allocation14 + $0x4]] %s1735_s7 }
  0x61   : > { %s1227_s24 = sadd.s32 134217728, %s1226_s25  ;;  %391 = sst [smem:[#allocation14 + $0x5]] %s1736_s28 }
  0x62   : > { %393 = dma.general (%p1222_p12), %s359_s18, %s1221_s26, %s375_s29, %s342_s27, %s1737_s13, [#allocation14], %s1227_s24, 0  }
  0x63 PF: > { %399 = sbr.rel (%p1852_p10) target bundleno = 1045 (0x415), region = 56  ;;  %s401_s3 = sand.u32 (!%p1852_p10), 1, %s1709_s10  }
  0x64   : > { %s1230_s5 = sshll.u32 (!%p1852_p10), %s401_s3, 7  ;;  %s402_s15 = scalar_lea.sflag (!%p1852_p10), [#allocation4], %s401_s3 }
  0x65   : > { %s1923_s1 = scalar_lea.vmem (!%p1852_p10), [#allocation3], %s1230_s5 }
  0x68   : > { %1688 = dma.done.wait (%p1844_p8), %s402_s15, 2048  }
  0x69   : > { %1690 = vsyncadd (%p1844_p8), %s402_s15, 4294965248 }
  0x6a   : > { %1692 = dma.done.wait (%p1837_p5), [#allocation7], 2560  }
  0x6b   : > { %1694 = vsyncadd (%p1837_p5), [#allocation7], 4294964736 }
  0x6c   : > { %1696 = dma.done.wait (%p1837_p5), [#allocation10], 4096  }
  0x6d   : > { %1698 = vsyncadd (%p1837_p5), [#allocation10], 4294963200  ;;  %p1235_p3 = scmp.ne.s32.totalorder %s1717_s12, 0 }
  0x6f   : > { %460 = sbr.rel (%p1235_p3) target bundleno = 118 (0x76), region = 80 }
  0x74   : > { %vm461_vm0 = vcmask 261120   ;;  %v1738_v0 = vmov 0.0  }
  0x75   : > { %462 = vst.msk [vmem:[#allocation2] sm:$0xff] %vm461_vm0, %v1738_v0 }
  0x76 PF: > { %p1236_p8 = scmp.eq.s32.totalorder %s1717_s12, 1 }
  0x78   : > { %466 = sbr.rel (%p1236_p8) target bundleno = 155 (0x9b), region = 84 }
  0x7d   : > { %v467_v1 = vld [vmem:[%s1923_s1] sm:$0xff]  ;;  %v468_v2 = vld [vmem:[%s1923_s1 + $0x8] sm:$0xff]  ;;  %v469_v3 = vld [vmem:[%s1923_s1 + $0x10] sm:$0xff]  ;;  %vm484_vm1 = vcmask 261120   ;;  %vm565_vm2 = vcmask 1041409   ;;  %vm567_vm3 = vcmask 1042434  }
  0x7e   : > { %v470_v4 = vld [vmem:[%s1923_s1 + $0x18] sm:$0xff]  ;;  %v471_v5 = vld [vmem:[%s1923_s1 + $0x20] sm:$0xff]  ;;  %v472_v6 = vld [vmem:[%s1923_s1 + $0x28] sm:$0xff]  ;;  %v485_v7 = vsel %vm484_vm1, %v467_v1, 0.0  ;;  %v486_v8 = vsel %vm484_vm1, %v468_v2, 0.0  ;;  %v494_v9 = vsel %vm484_vm1, %v469_v3, 0.0 }
  0x7f   : > { %v473_v10 = vld [vmem:[%s1923_s1 + $0x30] sm:$0xff]  ;;  %v474_v11 = vld [vmem:[%s1923_s1 + $0x38] sm:$0xff]  ;;  %v475_v12 = vld [vmem:[%s1923_s1 + $0x40] sm:$0xff]  ;;  %v487_v13 = vadd.f32 %v486_v8, %v485_v7  ;;  %v495_v14 = vsel %vm484_vm1, %v470_v4, 0.0  ;;  %v503_v15 = vsel %vm484_vm1, %v471_v5, 0.0  ;;  %v504_v16 = vsel %vm484_vm1, %v472_v6, 0.0 }
  0x80   : > { %v476_v17 = vld [vmem:[%s1923_s1 + $0x48] sm:$0xff]  ;;  %v477_v18 = vld [vmem:[%s1923_s1 + $0x50] sm:$0xff]  ;;  %v478_v19 = vld [vmem:[%s1923_s1 + $0x58] sm:$0xff]  ;;  %v496_v20 = vadd.f32 %v495_v14, %v494_v9  ;;  %v505_v21 = vadd.f32 %v504_v16, %v503_v15  ;;  %v512_v22 = vsel %vm484_vm1, %v473_v10, 0.0  ;;  %v513_v23 = vsel %vm484_vm1, %v474_v11, 0.0 }
  0x81   : > { %v479_v24 = vld [vmem:[%s1923_s1 + $0x60] sm:$0xff]  ;;  %v488_v25 = vrot.slane %v487_v13, 4  ;;  %v514_v26 = vadd.f32 %v513_v23, %v512_v22  ;;  %v521_v27 = vsel %vm484_vm1, %v475_v12, 0.0  ;;  %v522_v28 = vsel %vm484_vm1, %v476_v17, 0.0  ;;  %v480_v29 = vld [vmem:[%s1923_s1 + $0x68] sm:$0xff]  ;;  %v481_v30 = vld [vmem:[%s1923_s1 + $0x70] sm:$0xff] }
  0x82   : > { %v497_v31 = vrot.slane %v496_v20, 4  ;;  %v506_v32 = vrot.slane %v505_v21, 4  ;;  %v523_v33 = vadd.f32 %v522_v28, %v521_v27  ;;  %v530_v34 = vsel %vm484_vm1, %v477_v18, 0.0  ;;  %v482_v39 = vld [vmem:[%s1923_s1 + $0x78] sm:$0xff] }
  0x83   : > { %v489_v35 = vadd.f32 %v488_v25, %v487_v13  ;;  %v515_v36 = vrot.slane %v514_v26, 4  ;;  %v531_v37 = vsel %vm484_vm1, %v478_v19, 0.0  ;;  %v539_v38 = vsel %vm484_vm1, %v479_v24, 0.0 }
  0x84   : > { %v498_v40 = vadd.f32 %v497_v31, %v496_v20  ;;  %v507_v41 = vadd.f32 %v506_v32, %v505_v21  ;;  %v524_v42 = vrot.slane %v523_v33, 4  ;;  %v532_v43 = vadd.f32 %v531_v37, %v530_v34 }
  0x85   : > { %v490_v44 = vrot.slane %v489_v35, 2  ;;  %v516_v45 = vadd.f32 %v515_v36, %v514_v26  ;;  %v540_v46 = vsel %vm484_vm1, %v480_v29, 0.0  ;;  %v548_v47 = vsel %vm484_vm1, %v481_v30, 0.0  ;;  %v483_v29 = vld [vmem:[#allocation2] sm:$0xff] }
  0x86   : > { %v499_v48 = vrot.slane %v498_v40, 2  ;;  %v508_v49 = vrot.slane %v507_v41, 2  ;;  %v525_v50 = vadd.f32 %v524_v42, %v523_v33  ;;  %v533_v51 = vrot.slane %v532_v43, 4 }
  0x87   : > { %v491_v52 = vadd.f32 %v490_v44, %v489_v35  ;;  %v517_v53 = vrot.slane %v516_v45, 2  ;;  %v541_v54 = vadd.f32 %v540_v46, %v539_v38  ;;  %v549_v55 = vsel %vm484_vm1, %v482_v39, 0.0 }
  0x88   : > { %v500_v56 = vadd.f32 %v499_v48, %v498_v40  ;;  %v509_v57 = vadd.f32 %v508_v49, %v507_v41  ;;  %v526_v58 = vrot.slane %v525_v50, 2  ;;  %v534_v59 = vadd.f32 %v533_v51, %v532_v43 }
  0x89   : > { %v492_v60 = vrot.slane %v491_v52, 1  ;;  %v518_v61 = vadd.f32 %v517_v53, %v516_v45  ;;  %v542_v62 = vrot.slane %v541_v54, 4  ;;  %v550_v63 = vadd.f32 %v549_v55, %v548_v47 }
  0x8a   : > { %v501_v0 = vrot.slane %v500_v56, 1  ;;  %v510_v1 = vrot.slane %v509_v57, 1  ;;  %v527_v2 = vadd.f32 %v526_v58, %v525_v50  ;;  %v535_v3 = vrot.slane %v534_v59, 2 }
  0x8b   : > { %v493_v4 = vadd.f32 %v492_v60, %v491_v52  ;;  %v519_v5 = vrot.slane %v518_v61, 1  ;;  %v543_v6 = vadd.f32 %v542_v62, %v541_v54  ;;  %v551_v7 = vrot.slane %v550_v63, 4 }
  0x8c   : > { %v502_v8 = vadd.f32 %v501_v0, %v500_v56  ;;  %v511_v9 = vadd.f32 %v510_v1, %v509_v57  ;;  %v528_v10 = vrot.slane %v527_v2, 1  ;;  %v536_v11 = vadd.f32 %v535_v3, %v534_v59 }
  0x8d   : > { %v520_v12 = vadd.f32 %v519_v5, %v518_v61  ;;  %v544_v13 = vrot.slane %v543_v6, 2  ;;  %v552_v14 = vadd.f32 %v551_v7, %v550_v63  ;;  %vm569_vm4 = vcmask 1043459  }
  0x8e   : > { %v529_v15 = vadd.f32 %v528_v10, %v527_v2  ;;  %v537_v16 = vrot.slane %v536_v11, 1  ;;  %v566_v17 = vsel %vm565_vm2, %v502_v8, %v493_v4  ;;  %vm571_vm5 = vcmask 1044484  }
  0x8f   : > { %v545_v18 = vadd.f32 %v544_v13, %v543_v6  ;;  %v553_v19 = vrot.slane %v552_v14, 2  ;;  %v568_v20 = vsel %vm567_vm3, %v511_v9, %v566_v17  ;;  %vm573_vm6 = vcmask 1045509  }
  0x90   : > { %v538_v21 = vadd.f32 %v537_v16, %v536_v11  ;;  %v570_v22 = vsel %vm569_vm4, %v520_v12, %v568_v20  ;;  %vm575_vm7 = vcmask 1046534   ;;  %vm577_vm8 = vcmask 1047559  }
  0x91   : > { %v546_v23 = vrot.slane %v545_v18, 1  ;;  %v554_v24 = vadd.f32 %v553_v19, %v552_v14  ;;  %v572_v25 = vsel %vm571_vm5, %v529_v15, %v570_v22 }
  0x92   : > { %v574_v26 = vsel %vm573_vm6, %v538_v21, %v572_v25 }
  0x93   : > { %v547_v27 = vadd.f32 %v546_v23, %v545_v18  ;;  %v555_v28 = vrot.slane %v554_v24, 1 }
  0x95   : > { %v556_v30 = vadd.f32 %v555_v28, %v554_v24  ;;  %v576_v31 = vsel %vm575_vm7, %v547_v27, %v574_v26 }
  0x97   : > { %v578_v32 = vsel %vm577_vm8, %v556_v30, %v576_v31 }
  0x98   : > { %v580_v33 = vadd.f32 %v578_v32, %v483_v29 }
  0x9a   : > { %581 = vst.msk [vmem:[#allocation2] sm:$0xff] %vm484_vm1, %v580_v33 }
  0x9b PF: > { %p1237_p5 = scmp.ne.s32.totalorder %s1717_s12, 1 }
  0x9c   : > { %s1238_s7 = sshll.u32 (!%p1237_p5), %s1717_s12, 4 }
  0x9d   : > { %585 = sbr.rel (%p1237_p5) target bundleno = 1030 (0x406), region = 88 }
  0xa2   : > { %v731_v34 = vld [vmem:[#allocation6 + $0x18] sm:$0xff]  ;;  %v603_v35 = vlaneseq  ;;  %v1739_v36 = vmov 0.0   ;;  %v730_v37 = vld [vmem:[#allocation6 + $0x10] sm:$0xff]  ;;  %vm1740_vm9 = vmmov 0   ;;  %v606_v38 = vstv %s1238_s7  ;;  %v729_v39 = vld [vmem:[#allocation6 + $0x8] sm:$0xff] }
  0xa3   : > { %1308 = vmatprep.subr.mxu0 %v1739_v36  ;;  %1316 = vmatprep.mubr.msk.f32.mxu0 %vm1740_vm9, %v1739_v36  ;;  %v728_v41 = vld [vmem:[#allocation6] sm:$0xff]  ;;  %v588_v43 = vld [vmem:[%s1923_s1 + $0x10] sm:$0xff]  ;;  %v587_v45 = vld [vmem:[%s1923_s1 + $0x8] sm:$0xff]  ;;  %vm628_vm11 = vcmask 261120   ;;  %vm709_vm13 = vcmask 1041409   ;;  %vm711_vm14 = vcmask 1042434  }
  0xa4   : > { %1309 = vmatpush3.msra.mxu0 %v731_v34  ;;  %v604_v40 = vshrl.u32 %v603_v35, 7  ;;  %1319 = vmatprep.subr.mxu1 %v1739_v36  ;;  %v586_v42 = vld [vmem:[%s1923_s1] sm:$0xff]  ;;  %v589_v46 = vld [vmem:[%s1923_s1 + $0x18] sm:$0xff]  ;;  %v591_v47 = vld [vmem:[%s1923_s1 + $0x28] sm:$0xff]  ;;  %vm713_vm15 = vcmask 1043459   ;;  %vm715_vm0 = vcmask 1044484  }
  0xa5   : > { %1310 = vmatprep.subr.mxu0 %v1739_v36  ;;  %v590_v44 = vld [vmem:[%s1923_s1 + $0x20] sm:$0xff]  ;;  %1351 = vmatprep.mubr.msk.f32.mxu1 %vm1740_vm9, %v1739_v36  ;;  %v592_v48 = vld [vmem:[%s1923_s1 + $0x30] sm:$0xff]  ;;  %v593_v49 = vld [vmem:[%s1923_s1 + $0x38] sm:$0xff]  ;;  %vm717_vm1 = vcmask 1045509   ;;  %vm719_vm2 = vcmask 1046534   ;;  %vm721_vm3 = vcmask 1047559  }
  0xa6   : > { %1311 = vmatpush3.msra.mxu0 %v730_v37  ;;  %v594_v50 = vld [vmem:[%s1923_s1 + $0x40] sm:$0xff]  ;;  %v605_v51 = vadd.s32 8, %v604_v40  ;;  %v607_v52 = vadd.s32 %v606_v38, %v604_v40  ;;  %v595_v53 = vld [vmem:[%s1923_s1 + $0x48] sm:$0xff]  ;;  %v596_v54 = vld [vmem:[%s1923_s1 + $0x50] sm:$0xff] }
  0xa7   : > { %1312 = vmatprep.subr.mxu0 %v1739_v36  ;;  %v598_v55 = vld [vmem:[%s1923_s1 + $0x60] sm:$0xff]  ;;  %v597_v56 = vld [vmem:[%s1923_s1 + $0x58] sm:$0xff]  ;;  %v599_v57 = vld [vmem:[%s1923_s1 + $0x68] sm:$0xff] }
  0xa8   : > { %1313 = vmatpush3.msra.mxu0 %v729_v39  ;;  %v600_v58 = vld [vmem:[%s1923_s1 + $0x70] sm:$0xff]  ;;  %v608_v59 = vadd.s32 %v606_v38, %v605_v51  ;;  %vm609_vm10 = vcmp.lt.s32.totalorder %v607_v52, 24  ;;  %v828_v0 = vld [vmem:[#allocation8 + $0x78] sm:$0xff]  ;;  %v826_v10 = vld [vmem:[#allocation8 + $0x68] sm:$0xff] }
  0xa9   : > { %1314 = vmatprep.subr.mxu0 %v1739_v36  ;;  %v611_v60 = vsel %vm609_vm10, %v586_v42, 0.0  ;;  %v613_v61 = vsel %vm609_vm10, %v588_v43, 0.0  ;;  %v615_v62 = vsel %vm609_vm10, %v590_v44, 0.0  ;;  %v617_v63 = vsel %vm609_vm10, %v592_v48, 0.0  ;;  %v827_v1 = vld [vmem:[#allocation8 + $0x70] sm:$0xff]  ;;  %v601_v2 = vld [vmem:[%s1923_s1 + $0x78] sm:$0xff]  ;;  %1320 = vmatpush3.msra.mxu1 %v828_v0 }
  0xaa   : > { %1315 = vmatpush3.msra.mxu0 %v728_v41  ;;  %vm610_vm12 = vcmp.lt.s32.totalorder %v608_v59, 24  ;;  %v619_v3 = vsel %vm609_vm10, %v594_v50, 0.0  ;;  %v621_v4 = vsel %vm609_vm10, %v596_v54, 0.0  ;;  %v623_v5 = vsel %vm609_vm10, %v598_v55, 0.0  ;;  %1321 = vmatprep.subr.mxu1 %v1739_v36  ;;  %v825_v19 = vld [vmem:[#allocation8 + $0x60] sm:$0xff]  ;;  %v824_v28 = vld [vmem:[#allocation8 + $0x58] sm:$0xff] }
  0xab   : > { %v612_v6 = vsel %vm610_vm12, %v587_v45, 0.0  ;;  %v614_v7 = vsel %vm610_vm12, %v589_v46, 0.0  ;;  %v616_v8 = vsel %vm610_vm12, %v591_v47, 0.0  ;;  %v618_v9 = vsel %vm610_vm12, %v593_v49, 0.0  ;;  %1354 = vmatprep.subr.mxu0 %v1739_v36  ;;  %1322 = vmatpush3.msra.mxu1 %v827_v1  ;;  %v823_v38 = vld [vmem:[#allocation8 + $0x50] sm:$0xff]  ;;  %v822_v47 = vld [vmem:[#allocation8 + $0x48] sm:$0xff] }
  0xac   : > { %v620_v11 = vsel %vm610_vm12, %v595_v53, 0.0  ;;  %v622_v12 = vsel %vm610_vm12, %v597_v56, 0.0  ;;  %v624_v13 = vsel %vm610_vm12, %v599_v57, 0.0  ;;  %v625_v14 = vsel %vm609_vm10, %v600_v58, 0.0  ;;  %1323 = vmatprep.subr.mxu1 %v1739_v36  ;;  %v821_v56 = vld [vmem:[#allocation8 + $0x40] sm:$0xff]  ;;  %v820_v1 = vld [vmem:[#allocation8 + $0x38] sm:$0xff] }
  0xad   : > { %v626_v15 = vsel %vm610_vm12, %v601_v2, 0.0  ;;  %v629_v16 = vsel %vm628_vm11, %v611_v60, 0.0  ;;  %v630_v17 = vsel %vm628_vm11, %v612_v6, 0.0  ;;  %v638_v18 = vsel %vm628_vm11, %v613_v61, 0.0  ;;  %1324 = vmatpush3.msra.mxu1 %v826_v10  ;;  %v819_v10 = vld [vmem:[#allocation8 + $0x30] sm:$0xff] }
  0xae   : > { %v631_v20 = vadd.f32 %v630_v17, %v629_v16  ;;  %v639_v21 = vsel %vm628_vm11, %v614_v7, 0.0  ;;  %v647_v22 = vsel %vm628_vm11, %v615_v62, 0.0  ;;  %v648_v23 = vsel %vm628_vm11, %v616_v8, 0.0  ;;  %1325 = vmatprep.subr.mxu1 %v1739_v36 }
  0xaf   : > { %v640_v24 = vadd.f32 %v639_v21, %v638_v18  ;;  %v649_v25 = vadd.f32 %v648_v23, %v647_v22  ;;  %v656_v26 = vsel %vm628_vm11, %v617_v63, 0.0  ;;  %v657_v27 = vsel %vm628_vm11, %v618_v9, 0.0  ;;  %1326 = vmatpush3.msra.mxu1 %v825_v19  ;;  %v818_v19 = vld [vmem:[#allocation8 + $0x28] sm:$0xff] }
  0xb0   : > { %v632_v29 = vrot.slane %v631_v20, 4  ;;  %v658_v30 = vadd.f32 %v657_v27, %v656_v26  ;;  %v665_v31 = vsel %vm628_vm11, %v619_v3, 0.0  ;;  %v666_v32 = vsel %vm628_vm11, %v620_v11, 0.0  ;;  %1327 = vmatprep.subr.mxu1 %v1739_v36  ;;  %v817_v26 = vld [vmem:[#allocation8 + $0x20] sm:$0xff] }
  0xb1   : > { %v641_v33 = vrot.slane %v640_v24, 4  ;;  %v650_v34 = vrot.slane %v649_v25, 4  ;;  %v667_v35 = vadd.f32 %v666_v32, %v665_v31  ;;  %v674_v37 = vsel %vm628_vm11, %v621_v4, 0.0  ;;  %1328 = vmatpush3.msra.mxu1 %v824_v28  ;;  %v816_v32 = vld [vmem:[#allocation8 + $0x18] sm:$0xff] }
  0xb2   : > { %v633_v39 = vadd.f32 %v632_v29, %v631_v20  ;;  %v659_v40 = vrot.slane %v658_v30, 4  ;;  %v675_v41 = vsel %vm628_vm11, %v622_v12, 0.0  ;;  %v683_v42 = vsel %vm628_vm11, %v623_v5, 0.0  ;;  %1329 = vmatprep.subr.mxu1 %v1739_v36 }
  0xb3   : > { %v642_v43 = vadd.f32 %v641_v33, %v640_v24  ;;  %v651_v44 = vadd.f32 %v650_v34, %v649_v25  ;;  %v668_v45 = vrot.slane %v667_v35, 4  ;;  %v676_v46 = vadd.f32 %v675_v41, %v674_v37  ;;  %1330 = vmatpush3.msra.mxu1 %v823_v38 }
  0xb4   : > { %v634_v48 = vrot.slane %v633_v39, 2  ;;  %v660_v49 = vadd.f32 %v659_v40, %v658_v30  ;;  %v684_v50 = vsel %vm628_vm11, %v624_v13, 0.0  ;;  %v692_v51 = vsel %vm628_vm11, %v625_v14, 0.0  ;;  %1331 = vmatprep.subr.mxu1 %v1739_v36  ;;  %v627_v40 = vld [vmem:[#allocation2] sm:$0xff] }
  0xb5   : > { %v643_v52 = vrot.slane %v642_v43, 2  ;;  %v652_v53 = vrot.slane %v651_v44, 2  ;;  %v669_v54 = vadd.f32 %v668_v45, %v667_v35  ;;  %v677_v55 = vrot.slane %v676_v46, 4  ;;  %1332 = vmatpush3.msra.mxu1 %v822_v47  ;;  %v815_v47 = vld [vmem:[#allocation8 + $0x10] sm:$0xff] }
  0xb6   : > { %v635_v57 = vadd.f32 %v634_v48, %v633_v39  ;;  %v661_v58 = vrot.slane %v660_v49, 2  ;;  %v685_v59 = vadd.f32 %v684_v50, %v683_v42  ;;  %v693_v60 = vsel %vm628_vm11, %v626_v15, 0.0  ;;  %1333 = vmatprep.subr.mxu1 %v1739_v36  ;;  %v814_v48 = vld [vmem:[#allocation8 + $0x8] sm:$0xff]  ;;  %v922_v50 = vld [vmem:[#allocation9 + $0x78] sm:$0xff] }
  0xb7   : > { %v644_v61 = vadd.f32 %v643_v52, %v642_v43  ;;  %v653_v62 = vadd.f32 %v652_v53, %v651_v44  ;;  %v670_v63 = vrot.slane %v669_v54, 2  ;;  %v678_v0 = vadd.f32 %v677_v55, %v676_v46  ;;  %1334 = vmatpush3.msra.mxu1 %v821_v56  ;;  %v920_v52 = vld [vmem:[#allocation9 + $0x68] sm:$0xff]  ;;  %v919_v53 = vld [vmem:[#allocation9 + $0x60] sm:$0xff]  ;;  %v917_v55 = vld [vmem:[#allocation9 + $0x50] sm:$0xff] }
  0xb8   : > { %v636_v2 = vrot.slane %v635_v57, 1  ;;  %v662_v3 = vadd.f32 %v661_v58, %v660_v49  ;;  %v686_v4 = vrot.slane %v685_v59, 4  ;;  %v694_v5 = vadd.f32 %v693_v60, %v692_v51  ;;  %1335 = vmatprep.subr.mxu1 %v1739_v36  ;;  %v813_v49 = vld [vmem:[#allocation8] sm:$0xff]  ;;  %v921_v51 = vld [vmem:[#allocation9 + $0x70] sm:$0xff]  ;;  %v916_v56 = vld [vmem:[#allocation9 + $0x48] sm:$0xff] }
  0xb9   : > { %v645_v6 = vrot.slane %v644_v61, 1  ;;  %v654_v7 = vrot.slane %v653_v62, 1  ;;  %v671_v8 = vadd.f32 %v670_v63, %v669_v54  ;;  %v679_v9 = vrot.slane %v678_v0, 2  ;;  %1336 = vmatpush3.msra.mxu1 %v820_v1  ;;  %v918_v54 = vld [vmem:[#allocation9 + $0x58] sm:$0xff]  ;;  %v912_v60 = vld [vmem:[#allocation9 + $0x28] sm:$0xff] }
  0xba   : > { %v637_v11 = vadd.f32 %v636_v2, %v635_v57  ;;  %v663_v12 = vrot.slane %v662_v3, 1  ;;  %v687_v13 = vadd.f32 %v686_v4, %v685_v59  ;;  %v695_v14 = vrot.slane %v694_v5, 4  ;;  %1337 = vmatprep.subr.mxu1 %v1739_v36  ;;  %v915_v57 = vld [vmem:[#allocation9 + $0x40] sm:$0xff]  ;;  %v914_v58 = vld [vmem:[#allocation9 + $0x38] sm:$0xff]  ;;  %v913_v59 = vld [vmem:[#allocation9 + $0x30] sm:$0xff] }
  0xbb   : > { %v646_v15 = vadd.f32 %v645_v6, %v644_v61  ;;  %v655_v16 = vadd.f32 %v654_v7, %v653_v62  ;;  %v672_v17 = vrot.slane %v671_v8, 1  ;;  %v680_v18 = vadd.f32 %v679_v9, %v678_v0  ;;  %1338 = vmatpush3.msra.mxu1 %v819_v10  ;;  %v911_v61 = vld [vmem:[#allocation9 + $0x20] sm:$0xff]  ;;  %v910_v62 = vld [vmem:[#allocation9 + $0x18] sm:$0xff]  ;;  %v909_v4 = vld [vmem:[#allocation9 + $0x10] sm:$0xff] }
  0xbc   : > { %v664_v20 = vadd.f32 %v663_v12, %v662_v3  ;;  %v688_v21 = vrot.slane %v687_v13, 2  ;;  %v696_v22 = vadd.f32 %v695_v14, %v694_v5  ;;  %1339 = vmatprep.subr.mxu1 %v1739_v36  ;;  %v1239_v63 = vld [vmem:[%s2137_s2] ss:$0 sm:$0xff]  ;;  %v908_v5 = vld [vmem:[#allocation9 + $0x8] sm:$0xff]  ;;  %v907_v6 = vld [vmem:[#allocation9] sm:$0xff] }
  0xbd   : > { %v673_v23 = vadd.f32 %v672_v17, %v671_v8  ;;  %v681_v24 = vrot.slane %v680_v18, 1  ;;  %v710_v25 = vsel %vm709_vm13, %v646_v15, %v637_v11  ;;  %1340 = vmatpush3.msra.mxu1 %v818_v19  ;;  %v1016_v7 = vld [vmem:[#allocation11 + $0x78] sm:$0xff]  ;;  %v1015_v8 = vld [vmem:[#allocation11 + $0x70] sm:$0xff]  ;;  %v1014_v9 = vld [vmem:[#allocation11 + $0x68] sm:$0xff] }
  0xbe   : > { %v689_v27 = vadd.f32 %v688_v21, %v687_v13  ;;  %v697_v28 = vrot.slane %v696_v22, 2  ;;  %v712_v29 = vsel %vm711_vm14, %v655_v16, %v710_v25  ;;  %1341 = vmatprep.subr.mxu1 %v1739_v36  ;;  %v1013_v10 = vld [vmem:[#allocation11 + $0x60] sm:$0xff]  ;;  %v1012_v11 = vld [vmem:[#allocation11 + $0x58] sm:$0xff]  ;;  %v1011_v12 = vld [vmem:[#allocation11 + $0x50] sm:$0xff] }
  0xbf   : > { %v682_v30 = vadd.f32 %v681_v24, %v680_v18  ;;  %v714_v31 = vsel %vm713_vm15, %v664_v20, %v712_v29  ;;  %1342 = vmatpush3.msra.mxu1 %v817_v26  ;;  %v1010_v13 = vld [vmem:[#allocation11 + $0x48] sm:$0xff]  ;;  %v1009_v14 = vld [vmem:[#allocation11 + $0x40] sm:$0xff]  ;;  %v1008_v15 = vld [vmem:[#allocation11 + $0x38] sm:$0xff] }
  0xc0   : > { %v690_v33 = vrot.slane %v689_v27, 1  ;;  %v698_v34 = vadd.f32 %v697_v28, %v696_v22  ;;  %v716_v35 = vsel %vm715_vm0, %v673_v23, %v714_v31  ;;  %1343 = vmatprep.subr.mxu1 %v1739_v36  ;;  %v1007_v16 = vld [vmem:[#allocation11 + $0x30] sm:$0xff]  ;;  %v1006_v17 = vld [vmem:[#allocation11 + $0x28] sm:$0xff]  ;;  %v1005_v18 = vld [vmem:[#allocation11 + $0x20] sm:$0xff] }
  0xc1   : > { %v718_v37 = vsel %vm717_vm1, %v682_v30, %v716_v35  ;;  %1344 = vmatpush3.msra.mxu1 %v816_v32  ;;  %v1004_v19 = vld [vmem:[#allocation11 + $0x18] sm:$0xff]  ;;  %v1003_v25 = vld [vmem:[#allocation11 + $0x10] sm:$0xff]  ;;  %v1002_v26 = vld [vmem:[#allocation11 + $0x8] sm:$0xff] }
  0xc2   : > { %v691_v38 = vadd.f32 %v690_v33, %v689_v27  ;;  %v699_v39 = vrot.slane %v698_v34, 1  ;;  %1345 = vmatprep.subr.mxu1 %v1739_v36  ;;  %v1241_v20 = vld [vmem:[%s2139_s4] ss:$0 sm:$0xff]  ;;  %v1001_v27 = vld [vmem:[#allocation11] sm:$0xff] }
  0xc3   : > { %1346 = vmatpush3.msra.mxu1 %v815_v47  ;;  %v1242_v28 = vld [vmem:[%s2141_s6] ss:$0 sm:$0xff] }
  0xc4   : > { %v700_v41 = vadd.f32 %v699_v39, %v698_v34  ;;  %v720_v42 = vsel %vm719_vm2, %v691_v38, %v718_v37  ;;  %1347 = vmatprep.subr.mxu1 %v1739_v36  ;;  %v1243_v33 = vld [vmem:[%s2143_s8] ss:$0 sm:$0xff] }
  0xc5   : > { %1348 = vmatpush3.msra.mxu1 %v814_v48 }
  0xc6   : > { %v722_v43 = vsel %vm721_vm3, %v700_v41, %v720_v42  ;;  %1349 = vmatprep.subr.mxu1 %v1739_v36 }
  0xc7   : > { %v724_v44 = vadd.f32 %v722_v43, %v627_v40  ;;  %1350 = vmatpush3.msra.mxu1 %v813_v49 }
  0xc8   : > { %1389 = vmatprep.subr.mxu1 %v1739_v36 }
  0xc9   : > { %725 = vst.msk [vmem:[#allocation2] sm:$0xff] %vm628_vm11, %v724_v44 }
  0xd0   : > { %v726_v45 = vld [vmem:[#allocation2] sm:$0xff] }
  0xd1   : > { %v727_v46 = vmul.f32 0.041666668, %v726_v45 }
  0xd3   : > { %1317 = vmatmul.mubr.msk.f32.vlgmr.msra.gmra.mxu0 %vm628_vm11, %v727_v46 }
  0xd4   : > { %1386 = vmatprep.mubr.msk.f32.mxu0 %vm1740_vm9, %v1739_v36  ;;  %1355 = vmatpush3.msra.mxu0 %v922_v50 }
  0xd5   : > { %1356 = vmatprep.subr.mxu0 %v1739_v36 }
  0xd6   : > { %1357 = vmatpush3.msra.mxu0 %v921_v51 }
  0xd7   : > { %1358 = vmatprep.subr.mxu0 %v1739_v36 }
  0xd8   : > { %1359 = vmatpush3.msra.mxu0 %v920_v52 }
  0xd9   : > { %1360 = vmatprep.subr.mxu0 %v1739_v36 }
  0xda   : > { %1361 = vmatpush3.msra.mxu0 %v919_v53 }
  0xdb   : > { %1362 = vmatprep.subr.mxu0 %v1739_v36 }
  0xdc   : > { %1363 = vmatpush3.msra.mxu0 %v918_v54 }
  0xdd   : > { %1364 = vmatprep.subr.mxu0 %v1739_v36 }
  0xde   : > { %1365 = vmatpush3.msra.mxu0 %v917_v55 }
  0xdf   : > { %1366 = vmatprep.subr.mxu0 %v1739_v36 }
  0xe0   : > { %1367 = vmatpush3.msra.mxu0 %v916_v56 }
  0xe1   : > { %1368 = vmatprep.subr.mxu0 %v1739_v36 }
  0xe2   : > { %1369 = vmatpush3.msra.mxu0 %v915_v57 }
  0xe3   : > { %1370 = vmatprep.subr.mxu0 %v1739_v36 }
  0xe4   : > { %1371 = vmatpush3.msra.mxu0 %v914_v58 }
  0xe5   : > { %1372 = vmatprep.subr.mxu0 %v1739_v36 }
  0xe6   : > { %1373 = vmatpush3.msra.mxu0 %v913_v59 }
  0xe7   : > { %1374 = vmatprep.subr.mxu0 %v1739_v36 }
  0xe8   : > { %1375 = vmatpush3.msra.mxu0 %v912_v60 }
  0xe9   : > { %1376 = vmatprep.subr.mxu0 %v1739_v36 }
  0xea   : > { %1377 = vmatpush3.msra.mxu0 %v911_v61 }
  0xeb   : > { %1378 = vmatprep.subr.mxu0 %v1739_v36 }
  0xec   : > { %1379 = vmatpush3.msra.mxu0 %v910_v62 }
  0xed   : > { %1380 = vmatprep.subr.mxu0 %v1739_v36 }
  0xee   : > { %1381 = vmatpush3.msra.mxu0 %v909_v4 }
  0xef   : > { %1382 = vmatprep.subr.mxu0 %v1739_v36 }
  0xf0   : > { %1383 = vmatpush3.msra.mxu0 %v908_v5 }
  0xf1   : > { %1384 = vmatprep.subr.mxu0 %v1739_v36 }
  0xf2   : > { %1385 = vmatpush3.msra.mxu0 %v907_v6 }
 0x193   : > { %v808_v0 = vpop.f32.mrf.mxu0 }
 0x194   : > { %v809_v1 = vadd.f32 %v1239_v63, %v808_v0 }
 0x195   : > { %v1318_v2 = vpop.f32.mrf.mxu0 }
 0x196   : > { %v812_v3 = vmax.f32 %v809_v1, 0.0 }
 0x198   : > { %1352 = vmatmul.mubr.f32.vlgmr.msra.gmra.mxu1 %v812_v3 }
 0x199   : > { %1421 = vmatprep.mubr.msk.f32.mxu1 %vm1740_vm9, %v1739_v36  ;;  %1390 = vmatpush3.msra.mxu1 %v1016_v7 }
 0x19a   : > { %1391 = vmatprep.subr.mxu1 %v1739_v36 }
 0x19b   : > { %1392 = vmatpush3.msra.mxu1 %v1015_v8 }
 0x19c   : > { %1393 = vmatprep.subr.mxu1 %v1739_v36 }
 0x19d   : > { %1394 = vmatpush3.msra.mxu1 %v1014_v9 }
 0x19e   : > { %1395 = vmatprep.subr.mxu1 %v1739_v36 }
 0x19f   : > { %1396 = vmatpush3.msra.mxu1 %v1013_v10 }
 0x1a0   : > { %1397 = vmatprep.subr.mxu1 %v1739_v36 }
 0x1a1   : > { %1398 = vmatpush3.msra.mxu1 %v1012_v11 }
 0x1a2   : > { %1399 = vmatprep.subr.mxu1 %v1739_v36 }
 0x1a3   : > { %1400 = vmatpush3.msra.mxu1 %v1011_v12 }
 0x1a4   : > { %1401 = vmatprep.subr.mxu1 %v1739_v36 }
 0x1a5   : > { %1402 = vmatpush3.msra.mxu1 %v1010_v13 }
 0x1a6   : > { %1403 = vmatprep.subr.mxu1 %v1739_v36 }
 0x1a7   : > { %1404 = vmatpush3.msra.mxu1 %v1009_v14 }
 0x1a8   : > { %1405 = vmatprep.subr.mxu1 %v1739_v36 }
 0x1a9   : > { %1406 = vmatpush3.msra.mxu1 %v1008_v15 }
 0x1aa   : > { %1407 = vmatprep.subr.mxu1 %v1739_v36 }
 0x1ab   : > { %1408 = vmatpush3.msra.mxu1 %v1007_v16 }
 0x1ac   : > { %1409 = vmatprep.subr.mxu1 %v1739_v36 }
 0x1ad   : > { %1410 = vmatpush3.msra.mxu1 %v1006_v17 }
 0x1ae   : > { %1411 = vmatprep.subr.mxu1 %v1739_v36 }
 0x1af   : > { %1412 = vmatpush3.msra.mxu1 %v1005_v18 }
 0x1b0   : > { %1413 = vmatprep.subr.mxu1 %v1739_v36 }
 0x1b1   : > { %1414 = vmatpush3.msra.mxu1 %v1004_v19 }
 0x1b2   : > { %1415 = vmatprep.subr.mxu1 %v1739_v36 }
 0x1b3   : > { %1416 = vmatpush3.msra.mxu1 %v1003_v25 }
 0x1b4   : > { %1417 = vmatprep.subr.mxu1 %v1739_v36 }
 0x1b5   : > { %1418 = vmatpush3.msra.mxu1 %v1002_v26 }
 0x1b6   : > { %1419 = vmatprep.subr.mxu1 %v1739_v36 }
 0x1b7   : > { %1420 = vmatpush3.msra.mxu1 %v1001_v27 }
 0x258   : > { %v902_v21 = vpop.f32.mrf.mxu1 }
 0x259   : > { %v903_v22 = vadd.f32 %v1241_v20, %v902_v21 }
 0x25a   : > { %v1353_v23 = vpop.f32.mrf.mxu1 }
 0x25b   : > { %v906_v24 = vmax.f32 %v903_v22, 0.0 }
 0x25d   : > { %1387 = vmatmul.mubr.f32.vlgmr.msra.gmra.mxu0 %v906_v24 }
 0x31d   : > { %v996_v29 = vpop.f32.mrf.mxu0 }
 0x31e   : > { %v997_v30 = vadd.f32 %v1242_v28, %v996_v29 }
 0x31f   : > { %v1388_v31 = vpop.f32.mrf.mxu0 }
 0x320   : > { %v1000_v32 = vmax.f32 %v997_v30, 0.0 }
 0x322   : > { %1422 = vmatmul.mubr.f32.vlgmr.msra.gmra.mxu1 %v1000_v32 }
 0x3e2   : > { %v1090_v34 = vpop.f32.mrf.mxu1 }
 0x3e3   : > { %v1091_v35 = vadd.f32 %v1243_v33, %v1090_v34 }
 0x3e4   : > { %v1423_v37 = vpop.f32.mrf.mxu1 }
 0x3e5   : > { %v1244_v38 = vmul.f32 -1.442695, %v1091_v35 }
 0x3e7   : > { %1531 = vpow2.f32 %v1244_v38 }
 0x3f4   : > { %v1532_v36 = vpop.eup %1531 }
 0x3f5   : > { %v1097_v39 = vadd.f32 1.0, %v1532_v36 }
 0x3f7   : > { %1533 = vrcp.f32 %v1097_v39 }
 0x404   : > { %v1534_v40 = vpop.eup %1533 }
 0x405   : > { %1100 = vst [vmem:[#allocation12] sm:$0xff] %v1534_v40 }
 0x406 PF: > { %s2163_s17 = sadd.s32 4294967295, %s1725_s14   ;;  %s1741_s16 = smov [#allocation12]  }
 0x407   : > { %p2102_p10 = scmp.eq.s32.totalorder %s2163_s17, 1  ;;  %s1110_s29 = sshll.u32 %s1741_s16, 4  ;;  %s1111_s29 = int_to_ptr.vmem [resolvable:$true] %s1110_s29 }
 0x408   : > { %s1639_s19 = scalar_lea.vmem %s1111_s29, 128  ;;  %p1646_p1 = scmp.lt.s32.totalorder %s1111_s29, %s1111_s29 }
 0x409   : > { %p1640_p7 = scmp.ne.s32.totalorder %s1111_s29, %s1639_s19  ;;  %p1647_p0 = scmp.lt.s32.totalorder %s1639_s19, %s1639_s19 }
 0x40b   : > { %p1641_p9 = pnand %p1640_p7, %p2102_p10  ;;  %p1648_p2 = por %p1647_p0, %p1646_p1 }
 0x40d   : > { %p1642_p11 = pneg %p1641_p9 }
 0x40f   : > { %p1649_p4 = pnand %p1648_p2, %p1642_p11 }
 0x411   : > { %1652 = shalt.err (!%p1649_p4)
}
 0x412   : > { %1442 = dma.vmem_to_hbm [thread:$0]  (%p2102_p10), %s1111_s29, 128, %s2144_s9, [#allocation5]  }
 0x413   : > { %1700 = dma.done.wait (%p2102_p10), [#allocation5], 128  }
 0x414   : > { %1702 = vsyncadd (%p2102_p10), [#allocation5], 4294967168 }
 0x415 PF: > { %s25_s14 = sadd.s32 1, %s1725_s14   ;;  %s2165_s12 = sld [smem:[#allocation19_spill]] }
 0x416   : > { %p22_p6 = scmp.ge.s32.totalorder %s25_s14, 4   ;;  %s2166_s13 = sld [smem:[#allocation20_spill]] }
 0x417   : > { %s2167_s30 = smov %s1709_s10  ;;  %s2168_s10 = smov %s1713_s11 }
 0x418   : > { %s2169_s11 = smov %s1850_s22  ;;  %24 = sbr.rel (!%p22_p6) target bundleno = 12 (0xc), region = 127 }
 0x41d   :  { %1123 = vsyncpa [#allocation4], 1 }
 0x41e   :  { %1125 = vsyncpa [#allocation4 + $0x1], 1 }
 0x41f   :  { %1126 = vsyncpa [#allocation7], 1 }
 0x420   :  { %1127 = vsyncpa [#allocation10], 1 }
 0x421   :  { %1128 = vsyncpa [#allocation5], 1 }
 0x422   :  { %1130 = vsyncpa [#allocation5 + $0x1], 1 }

</bundles_post_ra>
